<compile_context>
chip_gen: v7x
topology: tpu7x:2x2x1
jax: 0.10.0
libtpu: 0.0.40
codegen_flags: <defaults>
</compile_context>

<pallas_src>
import functools
import math

import jax
import jax.numpy as jnp
import numpy as np
from jax import lax
from jax.experimental import pallas as pl
from jax.experimental.pallas import tpu as pltpu


def _round_up(n, m):
    return ((n + m - 1) // m) * m


def _vmem_limit_bytes():
    """Scoped VMEM limit sized from the chip (v5e/v6e 128 MiB, v7x 64 MiB/TC),
    leaving headroom for compiler scratch."""
    try:
        cap = pltpu.get_tpu_info().vmem_capacity_bytes
    except Exception:
        cap = 64 * 1024 * 1024
    return int(max(32 * 1024 * 1024,
                   min(cap - 16 * 1024 * 1024, 100 * 1024 * 1024)))


def _spec(block_shape, index_map, *, single_buffered=False):
    """BlockSpec helper.  single_buffered=True requests ONE VMEM buffer for
    grid-invariant operands (constant index map) so the default double buffer
    is not wasted; falls back silently if the API is unavailable."""
    if single_buffered:
        try:
            return pl.BlockSpec(block_shape, index_map,
                                pipeline_mode=pl.Buffered(1))
        except Exception:
            pass
    return pl.BlockSpec(block_shape, index_map)


# --------------------------------------------------------------------------
# Attention kernel: grid = (batch, head, q-row block)
# --------------------------------------------------------------------------
def attn_kernel(x_ref, mask_ref, prev_ref,
                wq_ref, bq_ref, wkv_ref, bkv_ref, wo_ref,
                attn_ref, score_ref,
                k_scr, v_scr, *, d_k, tq):
    h = pl.program_id(1)
    qi = pl.program_id(2)

    # Zero the resident per-batch-row attention-output accumulator once.
    @pl.when((h == 0) & (qi == 0))
    def _init():
        attn_ref[...] = jnp.zeros_like(attn_ref)

    # K / V of this (batch, head): one fused (T,D)@(D,2*d_k) MXU matmul per
    # head, stored in VMEM scratch and reused by every q-row block.
    @pl.when(qi == 0)
    def _project_kv():
        kv = jnp.dot(x_ref[0], wkv_ref[0],
                     preferred_element_type=jnp.float32) + bkv_ref[0]
        # One-time (per b,h) lane slice; the per-qi steady state does no slicing.
        k_scr[...] = kv[:, :d_k].astype(jnp.bfloat16)
        v_scr[...] = kv[:, d_k:].astype(jnp.bfloat16)

    row0 = pl.multiple_of(qi * tq, tq)
    xq = x_ref[0, pl.ds(row0, tq), :]                       # (tq, D) bf16
    # 1/sqrt(d_k) already folded into wq / bq at weight-prep time.
    q = (jnp.dot(xq, wq_ref[0], preferred_element_type=jnp.float32)
         + bq_ref[0]).astype(jnp.bfloat16)                  # (tq, d_k)

    # Residual ("RealFormer") attention scores, returned pre-softmax in f32.
    s = lax.dot_general(q, k_scr[...], (((1,), (1,)), ((), ())),
                        preferred_element_type=jnp.float32)  # (tq, T_pad)
    s = s + prev_ref[0, 0]
    score_ref[0, 0] = s

    # Masked softmax (f32 score math; matches reference jnp.where semantics).
    sm = jnp.where(mask_ref[0] == 0.0, -1e9, s)
    m = jnp.max(sm, axis=-1, keepdims=True)
    e = jnp.exp(sm - m)
    p = (e * pl.reciprocal(jnp.sum(e, axis=-1, keepdims=True),
                           approx=True)).astype(jnp.bfloat16)

    head_out = jnp.dot(p, v_scr[...],
                       preferred_element_type=jnp.float32)   # (tq, d_k)

    # Per-head output-projection accumulation into the resident f32 output
    # block (index map depends only on b -> written back once per batch row).
    attn_ref[0, pl.ds(row0, tq), :] += jnp.dot(
        head_out.astype(jnp.bfloat16), wo_ref[0],
        preferred_element_type=jnp.float32)


# --------------------------------------------------------------------------
# FFN kernel: row-tiled Linear -> ReLU -> Linear (bo folded into bias 1).
# --------------------------------------------------------------------------
def ffn_kernel(a_ref, w1_ref, b1_ref, w2_ref, b2_ref, y_ref):
    a = a_ref[...].astype(jnp.bfloat16)                      # (tm, D)
    hdn = jnp.dot(a, w1_ref[...],
                  preferred_element_type=jnp.float32) + b1_ref[...]
    hdn = jnp.maximum(hdn, 0.0).astype(jnp.bfloat16)         # (tm, d_ff)
    y_ref[...] = (jnp.dot(hdn, w2_ref[...],
                          preferred_element_type=jnp.float32)
                  + b2_ref[...]).astype(y_ref.dtype)


# --------------------------------------------------------------------------
# Wrapper
# --------------------------------------------------------------------------
def tasa_layers(x, mask, prev_scores, params, *, d_model, d_ff, n_heads):
    B, T, D = x.shape
    assert D == d_model and D % n_heads == 0
    H = n_heads
    d_k = D // H
    scale = 1.0 / math.sqrt(d_k)

    (wq, bq, wk, bk, wv, bv, wo, bo, w1, b1, w2, b2) = params

    # ---- one-time, head-major weight packing (outside the hot loop) ----
    def split_cols(w):   # (D, D) -> (H, D, d_k): output columns of head i
        return w.reshape(D, H, d_k).transpose(1, 0, 2)

    def split_bias(b):   # (1, D) -> (H, 1, d_k)
        return b.reshape(1, H, d_k).transpose(1, 0, 2)

    wq_h = (split_cols(wq) * scale).astype(jnp.bfloat16)      # scale folded in
    bq_h = (split_bias(bq) * scale).astype(jnp.float32)
    wkv_h = jnp.concatenate([split_cols(wk), split_cols(wv)],
                            axis=-1).astype(jnp.bfloat16)      # (H, D, 2*d_k)
    bkv_h = jnp.concatenate([split_bias(bk), split_bias(bv)],
                            axis=-1).astype(jnp.float32)       # (H, 1, 2*d_k)
    wo_h = wo.reshape(H, d_k, D).astype(jnp.bfloat16)          # (H, d_k, D)

    w1_b = w1.astype(jnp.bfloat16)
    w2_b = w2.astype(jnp.bfloat16)
    b1_f = (bo @ w1 + b1).astype(jnp.float32)  # fold attention out-bias bo into FFN bias
    b2_f = b2.astype(jnp.float32)

    # ---- pad T to a lane-dense multiple of 128 (score streams stay dense);
    #      padded key columns are masked, padded rows sliced off at the end. ----
    T_pad = _round_up(T, 128)
    pad = T_pad - T
    x_p = jnp.pad(x, ((0, 0), (0, pad), (0, 0))).astype(jnp.bfloat16)
    mask_p = jnp.pad(mask.astype(jnp.float32), ((0, 0), (0, pad)))  # pads -> masked
    prev_p = jnp.pad(prev_scores.astype(jnp.float32),
                     ((0, 0), (0, 0), (0, pad), (0, pad)))
    mask3 = mask_p.reshape(B, 1, T_pad)

    # q-row tile: VMEM footprint is O(tq * T_pad) instead of O(T_pad^2).
    tq = 256 if T_pad % 256 == 0 else 128
    nq = T_pad // tq

    vlim = _vmem_limit_bytes()

    in_specs = [
        pl.BlockSpec((1, T_pad, D), lambda b, h, q: (b, 0, 0)),          # x (bf16)
        pl.BlockSpec((1, 1, T_pad), lambda b, h, q: (b, 0, 0)),          # mask
        pl.BlockSpec((1, 1, tq, T_pad), lambda b, h, q: (b, h, q, 0)),   # prev scores
        pl.BlockSpec((1, D, d_k), lambda b, h, q: (h, 0, 0)),            # Wq (scaled)
        pl.BlockSpec((1, 1, d_k), lambda b, h, q: (h, 0, 0)),            # bq (scaled)
        pl.BlockSpec((1, D, 2 * d_k), lambda b, h, q: (h, 0, 0)),        # W[k|v]
        pl.BlockSpec((1, 1, 2 * d_k), lambda b, h, q: (h, 0, 0)),        # b[k|v]
        pl.BlockSpec((1, d_k, D), lambda b, h, q: (h, 0, 0)),            # Wo[h]
    ]
    out_specs = (
        # Attention output: index depends only on b -> resident accumulator
        # across (head, q-block); written back to HBM once per batch row.
        pl.BlockSpec((1, T_pad, D), lambda b, h, q: (b, 0, 0)),
        # Residual scores: q-row tiled, lane-dense writeback.
        pl.BlockSpec((1, 1, tq, T_pad), lambda b, h, q: (b, h, q, 0)),
    )

    attn_p, scores_p = pl.pallas_call(
        functools.partial(attn_kernel, d_k=d_k, tq=tq),
        out_shape=(jax.ShapeDtypeStruct((B, T_pad, D), jnp.float32),
                   jax.ShapeDtypeStruct((B, H, T_pad, T_pad), jnp.float32)),
        grid_spec=pltpu.PrefetchScalarGridSpec(
            num_scalar_prefetch=0,
            grid=(B, H, nq),
            in_specs=in_specs,
            out_specs=out_specs,
            scratch_shapes=[pltpu.VMEM((T_pad, d_k), jnp.bfloat16),   # K (head h)
                            pltpu.VMEM((T_pad, d_k), jnp.bfloat16)],  # V (head h)
        ),
        compiler_params=pltpu.CompilerParams(
            # batch parallel (megacore / v7x dual-TC); head & q-block axes are
            # accumulation axes for the attention output -> arbitrary.
            dimension_semantics=("parallel", "arbitrary", "arbitrary"),
            vmem_limit_bytes=vlim,
        ),
    )(x_p, mask3, prev_p, wq_h, bq_h, wkv_h, bkv_h, wo_h)

    # ---- FFN as a separate row-tiled pallas_call: keeps FFN weights out of
    #      the attention kernel's VMEM working set, single-buffers them, and
    #      bounds the (rows, d_ff) f32 temp to one row block. ----
    attn_flat = attn_p.reshape(B * T_pad, D)
    R = B * T_pad
    tm = 512 if R % 512 == 0 else (256 if R % 256 == 0 else 128)

    def wconst(shape):
        nd = len(shape)
        return _spec(shape, lambda i, _nd=nd: (0,) * _nd, single_buffered=True)

    y_flat = pl.pallas_call(
        ffn_kernel,
        out_shape=jax.ShapeDtypeStruct((R, D), jnp.float32),
        grid_spec=pltpu.PrefetchScalarGridSpec(
            num_scalar_prefetch=0,
            grid=(R // tm,),
            in_specs=[pl.BlockSpec((tm, D), lambda i: (i, 0)),
                      wconst(w1_b.shape), wconst(b1_f.shape),
                      wconst(w2_b.shape), wconst(b2_f.shape)],
            out_specs=pl.BlockSpec((tm, D), lambda i: (i, 0)),
        ),
        compiler_params=pltpu.CompilerParams(
            dimension_semantics=("parallel",),
            vmem_limit_bytes=vlim,
        ),
    )(attn_flat, w1_b, b1_f, w2_b, b2_f)

    y_p = y_flat.reshape(B, T_pad, D)
    return y_p[:, :T, :], scores_p[:, :, :T, :T]


# --------------------------------------------------------------------------
# Pure-JAX f32 reference
# --------------------------------------------------------------------------
def tasa_reference(x, mask, prev_scores, params, *, d_model, d_ff, n_heads):
    (wq, bq, wk, bk, wv, bv, wo, bo, w1, b1, w2, b2) = params
    B, T, D = x.shape
    H = n_heads
    d_k = D // H

    q = x @ wq + bq
    k = x @ wk + bk
    v = x @ wv + bv

    def split(a):  # (B,T,D) -> (B,H,T,d_k)
        return a.reshape(B, T, H, d_k).transpose(0, 2, 1, 3)

    qh, kh, vh = split(q), split(k), split(v)
    s = jnp.einsum("bhqd,bhkd->bhqk", qh, kh) / math.sqrt(d_k)
    s = s + prev_scores
    scores_out = s
    sm = jnp.where(mask[:, None, None, :] == 0.0, -1e9, s)
    p = jax.nn.softmax(sm, axis=-1)
    o = jnp.einsum("bhqk,bhkd->bhqd", p, vh)
    o = o.transpose(0, 2, 1, 3).reshape(B, T, D)
    o = o @ wo + bo
    y = jnp.maximum(o @ w1 + b1, 0.0) @ w2 + b2
    return y, scores_out


def init_params(key, d_model, d_ff):
    keys = jax.random.split(key, 12)

    def lin(kw, fan_in, fan_out):
        return jax.random.normal(kw, (fan_in, fan_out), jnp.float32) * (1.0 / math.sqrt(fan_in))

    wq = lin(keys[0], d_model, d_model); bq = jnp.zeros((1, d_model), jnp.float32)
    wk = lin(keys[1], d_model, d_model); bk = jnp.full((1, d_model), 0.01, jnp.float32)
    wv = lin(keys[2], d_model, d_model); bv = jnp.full((1, d_model), -0.01, jnp.float32)
    wo = lin(keys[3], d_model, d_model); bo = jnp.zeros((1, d_model), jnp.float32)
    w1 = lin(keys[4], d_model, d_ff);    b1 = jnp.full((1, d_ff), 0.02, jnp.float32)
    w2 = lin(keys[5], d_ff, d_model);    b2 = jnp.zeros((1, d_model), jnp.float32)
    return (wq, bq, wk, bk, wv, bv, wo, bo, w1, b1, w2, b2)


if __name__ == "__main__":
    # Small shapes consistent with the module's forward:
    #   x: [batch, time, d_model], mask: [batch, time],
    #   previous_attention_scores: [batch, h, time, time]
    B, T = 2, 8
    d_model, d_ff, H = 32, 64, 4

    key = jax.random.PRNGKey(0)
    kx, km, kp, kw = jax.random.split(key, 4)

    x = jax.random.normal(kx, (B, T, d_model), jnp.float32)
    mask = (jax.random.uniform(km, (B, T)) > 0.2).astype(jnp.float32)
    mask = mask.at[:, 0].set(1.0)  # keep at least one valid key position
    prev_scores = 0.1 * jax.random.normal(kp, (B, H, T, T), jnp.float32)

    params = init_params(kw, d_model, d_ff)

    y, scores = tasa_layers(x, mask, prev_scores, params,
                            d_model=d_model, d_ff=d_ff, n_heads=H)
    jax.block_until_ready((y, scores))

    y_ref, scores_ref = tasa_reference(x, mask, prev_scores, params,
                                       d_model=d_model, d_ff=d_ff, n_heads=H)
    # Tolerance sized for bf16 MXU operands + approx reciprocal vs f32 reference.
    np.testing.assert_allclose(np.asarray(y), np.asarray(y_ref), rtol=5e-2, atol=5e-2)
    np.testing.assert_allclose(np.asarray(scores), np.asarray(scores_ref),
                               rtol=5e-2, atol=5e-2)

    print("KERNEL_OK")
</pallas_src>

<mosaic_0001>
module attributes {stable_mosaic.version = 11 : i64} {
  func.func @attn_kernel(%arg0: i32, %arg1: i32, %arg2: i32, %arg3: memref<1x128x32xbf16, #tpu.memory_space<vmem>>, %arg4: memref<1x1x128xf32, #tpu.memory_space<vmem>>, %arg5: memref<1x1x128x128xf32, #tpu.memory_space<vmem>>, %arg6: memref<1x32x8xbf16, #tpu.memory_space<vmem>>, %arg7: memref<1x1x8xf32, #tpu.memory_space<vmem>>, %arg8: memref<1x32x16xbf16, #tpu.memory_space<vmem>>, %arg9: memref<1x1x16xf32, #tpu.memory_space<vmem>>, %arg10: memref<1x8x32xbf16, #tpu.memory_space<vmem>>, %arg11: memref<1x128x32xf32, #tpu.memory_space<vmem>>, %arg12: memref<1x1x128x128xf32, #tpu.memory_space<vmem>>, %arg13: memref<128x8xbf16, #tpu.memory_space<vmem>>, %arg14: memref<128x8xbf16, #tpu.memory_space<vmem>>) attributes {dimension_semantics = [#tpu.dimension_semantics<parallel>, #tpu.dimension_semantics<arbitrary>, #tpu.dimension_semantics<arbitrary>], iteration_bounds = array<i64: 2, 4, 1>, scalar_prefetch = 0 : i64, scratch_operands = 2 : i64, tpu.core_type = #tpu.core_type<tc>, window_params = [{transform_indices = @transform_0, window_bounds = array<i64: 1, 128, 32>}, {transform_indices = @transform_1, window_bounds = array<i64: 1, 1, 128>}, {transform_indices = @transform_2, window_bounds = array<i64: 1, 1, 128, 128>}, {transform_indices = @transform_3, window_bounds = array<i64: 1, 32, 8>}, {transform_indices = @transform_4, window_bounds = array<i64: 1, 1, 8>}, {transform_indices = @transform_5, window_bounds = array<i64: 1, 32, 16>}, {transform_indices = @transform_6, window_bounds = array<i64: 1, 1, 16>}, {transform_indices = @transform_7, window_bounds = array<i64: 1, 8, 32>}, {transform_indices = @transform_8, window_bounds = array<i64: 1, 128, 32>}, {transform_indices = @transform_9, window_bounds = array<i64: 1, 1, 128, 128>}]} {
    %c0_i32 = arith.constant 0 : i32
    %0 = arith.cmpi eq, %arg1, %c0_i32 : i32
    %c0_i32_0 = arith.constant 0 : i32
    %1 = arith.cmpi eq, %arg2, %c0_i32_0 : i32
    %2 = arith.andi %0, %1 : i1
    %3 = arith.extui %2 : i1 to i32
    %c0_i32_1 = arith.constant 0 : i32
    %4 = arith.cmpi ne, %3, %c0_i32_1 : i32
    scf.if %4 {
      %cst_40 = arith.constant 0.000000e+00 : f32
      %62 = vector.broadcast %cst_40 : f32 to vector<1x128x32xf32>
      %c0_41 = arith.constant 0 : index
      %c0_42 = arith.constant 0 : index
      %c0_43 = arith.constant 0 : index
      %63 = vector.load %arg11[%c0_41, %c0_42, %c0_43] : memref<1x128x32xf32, #tpu.memory_space<vmem>>, vector<1x128x32xf32>
      tpu.vector_store %arg11[%c0_41, %c0_42, %c0_43], %62 {strides = array<i32>} : memref<1x128x32xf32, #tpu.memory_space<vmem>>, vector<1x128x32xf32>,
    } else {
    }
    %c0_i32_2 = arith.constant 0 : i32
    %5 = arith.cmpi eq, %arg2, %c0_i32_2 : i32
    %6 = arith.extui %5 : i1 to i32
    %c0_i32_3 = arith.constant 0 : i32
    %7 = arith.cmpi ne, %6, %c0_i32_3 : i32
    scf.if %7 {
      %c0_40 = arith.constant 0 : index
      %c0_41 = arith.constant 0 : index
      %c0_42 = arith.constant 0 : index
      %62 = vector.load %arg3[%c0_40, %c0_41, %c0_42] : memref<1x128x32xbf16, #tpu.memory_space<vmem>>, vector<1x128x32xbf16>
      %63 = vector.shape_cast %62 : vector<1x128x32xbf16> to vector<128x32xbf16>
      %c0_43 = arith.constant 0 : index
      %c0_44 = arith.constant 0 : index
      %c0_45 = arith.constant 0 : index
      %64 = vector.load %arg8[%c0_43, %c0_44, %c0_45] : memref<1x32x16xbf16, #tpu.memory_space<vmem>>, vector<1x32x16xbf16>
      %65 = vector.shape_cast %64 : vector<1x32x16xbf16> to vector<32x16xbf16>
      %cst_46 = arith.constant dense<0.000000e+00> : vector<128x16xf32>
      %66 = tpu.matmul %63, %65, %cst_46 {dimension_numbers = #tpu.dot_dimension_numbers<[1], [0], [0], [1], [0, 0, 1, 1], [], []>} : vector<128x32xbf16>, vector<32x16xbf16>, vector<128x16xf32> -> vector<128x16xf32>
      %c0_47 = arith.constant 0 : index
      %c0_48 = arith.constant 0 : index
      %c0_49 = arith.constant 0 : index
      %67 = vector.load %arg9[%c0_47, %c0_48, %c0_49] : memref<1x1x16xf32, #tpu.memory_space<vmem>>, vector<1x1x16xf32>
      %68 = vector.shape_cast %67 : vector<1x1x16xf32> to vector<1x16xf32>
      %69 = vector.broadcast %68 : vector<1x16xf32> to vector<128x16xf32>
      %70 = arith.addf %66, %69 : vector<128x16xf32>
      %71 = vector.extract_strided_slice %70 {offsets = [0, 0], sizes = [128, 8], strides = [1, 1]} : vector<128x16xf32> to vector<128x8xf32>
      %72 = arith.truncf %71 : vector<128x8xf32> to vector<128x8xbf16>
      %c0_50 = arith.constant 0 : index
      %c0_51 = arith.constant 0 : index
      %73 = vector.load %arg13[%c0_50, %c0_51] : memref<128x8xbf16, #tpu.memory_space<vmem>>, vector<128x8xbf16>
      tpu.vector_store %arg13[%c0_50, %c0_51], %72 {strides = array<i32>} : memref<128x8xbf16, #tpu.memory_space<vmem>>, vector<128x8xbf16>,
      %74 = vector.extract_strided_slice %70 {offsets = [0, 8], sizes = [128, 8], strides = [1, 1]} : vector<128x16xf32> to vector<128x8xf32>
      %75 = arith.truncf %74 : vector<128x8xf32> to vector<128x8xbf16>
      %c0_52 = arith.constant 0 : index
      %c0_53 = arith.constant 0 : index
      %76 = vector.load %arg14[%c0_52, %c0_53] : memref<128x8xbf16, #tpu.memory_space<vmem>>, vector<128x8xbf16>
      tpu.vector_store %arg14[%c0_52, %c0_53], %75 {strides = array<i32>} : memref<128x8xbf16, #tpu.memory_space<vmem>>, vector<128x8xbf16>,
    } else {
    }
    %c128_i32 = arith.constant 128 : i32
    %8 = arith.muli %arg2, %c128_i32 : i32
    %9 = tpu.assume_multiple %8, 128 : i32
    %c0 = arith.constant 0 : index
    %10 = arith.index_cast %9 : i32 to index
    %c0_4 = arith.constant 0 : index
    %11 = vector.load %arg3[%c0, %10, %c0_4] : memref<1x128x32xbf16, #tpu.memory_space<vmem>>, vector<1x128x32xbf16>
    %12 = vector.shape_cast %11 : vector<1x128x32xbf16> to vector<128x32xbf16>
    %c0_5 = arith.constant 0 : index
    %c0_6 = arith.constant 0 : index
    %c0_7 = arith.constant 0 : index
    %13 = vector.load %arg6[%c0_5, %c0_6, %c0_7] : memref<1x32x8xbf16, #tpu.memory_space<vmem>>, vector<1x32x8xbf16>
    %14 = vector.shape_cast %13 : vector<1x32x8xbf16> to vector<32x8xbf16>
    %cst = arith.constant dense<0.000000e+00> : vector<128x8xf32>
    %15 = tpu.matmul %12, %14, %cst {dimension_numbers = #tpu.dot_dimension_numbers<[1], [0], [0], [1], [0, 0, 1, 1], [], []>} : vector<128x32xbf16>, vector<32x8xbf16>, vector<128x8xf32> -> vector<128x8xf32>
    %c0_8 = arith.constant 0 : index
    %c0_9 = arith.constant 0 : index
    %c0_10 = arith.constant 0 : index
    %16 = vector.load %arg7[%c0_8, %c0_9, %c0_10] : memref<1x1x8xf32, #tpu.memory_space<vmem>>, vector<1x1x8xf32>
    %17 = vector.shape_cast %16 : vector<1x1x8xf32> to vector<1x8xf32>
    %18 = vector.broadcast %17 : vector<1x8xf32> to vector<128x8xf32>
    %19 = arith.addf %15, %18 : vector<128x8xf32>
    %20 = arith.truncf %19 : vector<128x8xf32> to vector<128x8xbf16>
    %c0_11 = arith.constant 0 : index
    %c0_12 = arith.constant 0 : index
    %21 = vector.load %arg13[%c0_11, %c0_12] : memref<128x8xbf16, #tpu.memory_space<vmem>>, vector<128x8xbf16>
    %cst_13 = arith.constant dense<0.000000e+00> : vector<128x128xf32>
    %22 = tpu.matmul %20, %21, %cst_13 {dimension_numbers = #tpu.dot_dimension_numbers<[1], [1], [0], [0], [0, 0, 1, 0], [], []>} : vector<128x8xbf16>, vector<128x8xbf16>, vector<128x128xf32> -> vector<128x128xf32>
    %c0_14 = arith.constant 0 : index
    %c0_15 = arith.constant 0 : index
    %c0_16 = arith.constant 0 : index
    %c0_17 = arith.constant 0 : index
    %23 = vector.load %arg5[%c0_14, %c0_15, %c0_16, %c0_17] : memref<1x1x128x128xf32, #tpu.memory_space<vmem>>, vector<1x1x128x128xf32>
    %24 = vector.shape_cast %23 : vector<1x1x128x128xf32> to vector<128x128xf32>
    %25 = arith.addf %22, %24 : vector<128x128xf32>
    %c0_18 = arith.constant 0 : index
    %c0_19 = arith.constant 0 : index
    %c0_20 = arith.constant 0 : index
    %c0_21 = arith.constant 0 : index
    %26 = vector.load %arg12[%c0_18, %c0_19, %c0_20, %c0_21] : memref<1x1x128x128xf32, #tpu.memory_space<vmem>>, vector<1x1x128x128xf32>
    %27 = vector.shape_cast %26 : vector<1x1x128x128xf32> to vector<128x128xf32>
    %28 = vector.shape_cast %25 : vector<128x128xf32> to vector<1x1x128x128xf32>
    tpu.vector_store %arg12[%c0_18, %c0_19, %c0_20, %c0_21], %28 {strides = array<i32>} : memref<1x1x128x128xf32, #tpu.memory_space<vmem>>, vector<1x1x128x128xf32>,
    %c0_22 = arith.constant 0 : index
    %c0_23 = arith.constant 0 : index
    %c0_24 = arith.constant 0 : index
    %29 = vector.load %arg4[%c0_22, %c0_23, %c0_24] : memref<1x1x128xf32, #tpu.memory_space<vmem>>, vector<1x1x128xf32>
    %30 = vector.shape_cast %29 : vector<1x1x128xf32> to vector<1x128xf32>
    %cst_25 = arith.constant 0.000000e+00 : f32
    %31 = vector.broadcast %cst_25 : f32 to vector<1x128xf32>
    %32 = arith.cmpf oeq, %30, %31 : vector<1x128xf32>
    %cst_26 = arith.constant -1.000000e+09 : f32
    %33 = vector.shape_cast %32 : vector<1x128xi1> to vector<1x128xi1>
    %34 = vector.broadcast %33 : vector<1x128xi1> to vector<128x128xi1>
    %35 = vector.broadcast %cst_26 : f32 to vector<128x128xf32>
    %36 = arith.select %34, %35, %25 : vector<128x128xi1>, vector<128x128xf32>
    %cst_27 = arith.constant dense<0xFF800000> : vector<128xf32>
    %37 = vector.multi_reduction <maximumf>, %36, %cst_27 [1] : vector<128x128xf32> to vector<128xf32>
    %38 = vector.shape_cast %37 : vector<128xf32> to vector<128x1xf32>
    %39 = vector.broadcast %38 : vector<128x1xf32> to vector<128x128xf32>
    %40 = arith.subf %36, %39 : vector<128x128xf32>
    %41 = math.exp %40 : vector<128x128xf32>
    %cst_28 = arith.constant dense<0.000000e+00> : vector<128xf32>
    %42 = vector.multi_reduction <add>, %41, %cst_28 [1] : vector<128x128xf32> to vector<128xf32>
    %43 = vector.shape_cast %42 : vector<128xf32> to vector<128x1xf32>
    %44 = tpu.reciprocal %43 {approx = true} : vector<128x1xf32> -> vector<128x1xf32>
    %45 = vector.broadcast %44 : vector<128x1xf32> to vector<128x128xf32>
    %46 = arith.mulf %41, %45 : vector<128x128xf32>
    %47 = arith.truncf %46 : vector<128x128xf32> to vector<128x128xbf16>
    %c0_29 = arith.constant 0 : index
    %c0_30 = arith.constant 0 : index
    %48 = vector.load %arg14[%c0_29, %c0_30] : memref<128x8xbf16, #tpu.memory_space<vmem>>, vector<128x8xbf16>
    %cst_31 = arith.constant dense<0.000000e+00> : vector<128x8xf32>
    %49 = tpu.matmul %47, %48, %cst_31 {dimension_numbers = #tpu.dot_dimension_numbers<[1], [0], [0], [1], [0, 0, 1, 1], [], []>} : vector<128x128xbf16>, vector<128x8xbf16>, vector<128x8xf32> -> vector<128x8xf32>
    %c0_32 = arith.constant 0 : index
    %50 = arith.index_cast %9 : i32 to index
    %c0_33 = arith.constant 0 : index
    %51 = vector.load %arg11[%c0_32, %50, %c0_33] : memref<1x128x32xf32, #tpu.memory_space<vmem>>, vector<1x128x32xf32>
    %52 = vector.shape_cast %51 : vector<1x128x32xf32> to vector<128x32xf32>
    %53 = arith.truncf %49 : vector<128x8xf32> to vector<128x8xbf16>
    %c0_34 = arith.constant 0 : index
    %c0_35 = arith.constant 0 : index
    %c0_36 = arith.constant 0 : index
    %54 = vector.load %arg10[%c0_34, %c0_35, %c0_36] : memref<1x8x32xbf16, #tpu.memory_space<vmem>>, vector<1x8x32xbf16>
    %55 = vector.shape_cast %54 : vector<1x8x32xbf16> to vector<8x32xbf16>
    %cst_37 = arith.constant dense<0.000000e+00> : vector<128x32xf32>
    %56 = tpu.matmul %53, %55, %cst_37 {dimension_numbers = #tpu.dot_dimension_numbers<[1], [0], [0], [1], [0, 0, 1, 1], [], []>} : vector<128x8xbf16>, vector<8x32xbf16>, vector<128x32xf32> -> vector<128x32xf32>
    %57 = arith.addf %52, %56 : vector<128x32xf32>
    %c0_38 = arith.constant 0 : index
    %58 = arith.index_cast %9 : i32 to index
    %c0_39 = arith.constant 0 : index
    %59 = vector.load %arg11[%c0_38, %58, %c0_39] : memref<1x128x32xf32, #tpu.memory_space<vmem>>, vector<1x128x32xf32>
    %60 = vector.shape_cast %59 : vector<1x128x32xf32> to vector<128x32xf32>
    %61 = vector.shape_cast %57 : vector<128x32xf32> to vector<1x128x32xf32>
    tpu.vector_store %arg11[%c0_38, %58, %c0_39], %61 {strides = array<i32>} : memref<1x128x32xf32, #tpu.memory_space<vmem>>, vector<1x128x32xf32>,
    return
  }
  func.func @transform_0(%arg0: i32, %arg1: i32, %arg2: i32) -> (i32, i32, i32) {
    %c0_i32 = arith.constant 0 : i32
    %c0_i32_0 = arith.constant 0 : i32
    %c0_i32_1 = arith.constant 0 : i32
    return %arg0, %c0_i32, %c0_i32_0 : i32, i32, i32
  }
  func.func @transform_1(%arg0: i32, %arg1: i32, %arg2: i32) -> (i32, i32, i32) {
    %c0_i32 = arith.constant 0 : i32
    %c0_i32_0 = arith.constant 0 : i32
    %c0_i32_1 = arith.constant 0 : i32
    return %arg0, %c0_i32, %c0_i32_0 : i32, i32, i32
  }
  func.func @transform_2(%arg0: i32, %arg1: i32, %arg2: i32) -> (i32, i32, i32, i32) {
    %c0_i32 = arith.constant 0 : i32
    %c0_i32_0 = arith.constant 0 : i32
    return %arg0, %arg1, %arg2, %c0_i32 : i32, i32, i32, i32
  }
  func.func @transform_3(%arg0: i32, %arg1: i32, %arg2: i32) -> (i32, i32, i32) {
    %c0_i32 = arith.constant 0 : i32
    %c0_i32_0 = arith.constant 0 : i32
    %c0_i32_1 = arith.constant 0 : i32
    return %arg1, %c0_i32, %c0_i32_0 : i32, i32, i32
  }
  func.func @transform_4(%arg0: i32, %arg1: i32, %arg2: i32) -> (i32, i32, i32) {
    %c0_i32 = arith.constant 0 : i32
    %c0_i32_0 = arith.constant 0 : i32
    %c0_i32_1 = arith.constant 0 : i32
    return %arg1, %c0_i32, %c0_i32_0 : i32, i32, i32
  }
  func.func @transform_5(%arg0: i32, %arg1: i32, %arg2: i32) -> (i32, i32, i32) {
    %c0_i32 = arith.constant 0 : i32
    %c0_i32_0 = arith.constant 0 : i32
    %c0_i32_1 = arith.constant 0 : i32
    return %arg1, %c0_i32, %c0_i32_0 : i32, i32, i32
  }
  func.func @transform_6(%arg0: i32, %arg1: i32, %arg2: i32) -> (i32, i32, i32) {
    %c0_i32 = arith.constant 0 : i32
    %c0_i32_0 = arith.constant 0 : i32
    %c0_i32_1 = arith.constant 0 : i32
    return %arg1, %c0_i32, %c0_i32_0 : i32, i32, i32
  }
  func.func @transform_7(%arg0: i32, %arg1: i32, %arg2: i32) -> (i32, i32, i32) {
    %c0_i32 = arith.constant 0 : i32
    %c0_i32_0 = arith.constant 0 : i32
    %c0_i32_1 = arith.constant 0 : i32
    return %arg1, %c0_i32, %c0_i32_0 : i32, i32, i32
  }
  func.func @transform_8(%arg0: i32, %arg1: i32, %arg2: i32) -> (i32, i32, i32) {
    %c0_i32 = arith.constant 0 : i32
    %c0_i32_0 = arith.constant 0 : i32
    %c0_i32_1 = arith.constant 0 : i32
    return %arg0, %c0_i32, %c0_i32_0 : i32, i32, i32
  }
  func.func @transform_9(%arg0: i32, %arg1: i32, %arg2: i32) -> (i32, i32, i32, i32) {
    %c0_i32 = arith.constant 0 : i32
    %c0_i32_0 = arith.constant 0 : i32
    return %arg0, %arg1, %arg2, %c0_i32 : i32, i32, i32, i32
  }
}

</mosaic_0001>

<bundles_post_ra>
// kernel: tpu_custom_call.1
= control target key start
LH: loop header
LB: loop body
LE: loop exit
PB: predicated region body
PF: predicated region fallthrough
CT: control target
= control target key end

     0   :  { %s3231_s0 = inlined_call_operand.vmem [shape: bf16[2,128,32], index: 0, kind: input, shape index: {}]   ;;  %s3232_s1 = inlined_call_operand.vmem [shape: f32[2,1,128], index: 1, kind: input, shape index: {}]   ;;  %s3233_s2 = inlined_call_operand.hbm [shape: f32[2,4,128,128], index: 2, kind: input, shape index: {}]   ;;  %s3234_s3 = inlined_call_operand.vmem [shape: bf16[4,32,8], index: 3, kind: input, shape index: {}]   ;;  %s3235_s4 = inlined_call_operand.vmem [shape: f32[4,1,8], index: 4, kind: input, shape index: {}]   ;;  %s3236_s5 = inlined_call_operand.vmem [shape: bf16[4,32,16], index: 5, kind: input, shape index: {}]   ;;  %s3237_s6 = inlined_call_operand.vmem [shape: f32[4,1,16], index: 6, kind: input, shape index: {}]   ;;  %s3238_s7 = inlined_call_operand.vmem [shape: bf16[4,8,32], index: 7, kind: input, shape index: {}]   ;;  %s3239_s8 = inlined_call_operand.vmem [shape: f32[2,128,32], index: 8, kind: output, shape index: {0}]   ;;  %s3240_s9 = inlined_call_operand.hbm [shape: f32[2,4,128,128], index: 9, kind: output, shape index: {1}]  }
   0x1   :  { %3257 = sst [smem:[#allocation22_spill]] %s3231_s0 }
   0x2   :  { %3258 = sst [smem:[#allocation23_spill]] %s3233_s2 }
   0x3   :  { %3259 = sst [smem:[#allocation24_spill]] %s3234_s3 }
   0x4   :  { %3260 = sst [smem:[#allocation25_spill]] %s3237_s6 }
   0x5   :  { %3261 = sst [smem:[#allocation26_spill]] %s3238_s7 }
   0x6   :  { %3262 = sst [smem:[#allocation27_spill]] %s3239_s8 }
   0x7   :  { %3263 = sst [smem:[#allocation28_spill]] %s3240_s9 }
   0x8   :  { %15 = vsyncpa [#allocation5], 0 }
   0x9   :  { %17 = vsyncpa [#allocation5 + $0x1], 0 }
   0xa   :  { %18 = vsyncpa [#allocation6], 0 }
   0xb   :  { %20 = vsyncpa [#allocation6 + $0x1], 0  ;;  %s2528_s30 = smov 0   ;;  %s2530_s10 = smov 0  }
   0xc   :  { %s2532_s11 = smov 0   ;;  %s2534_s12 = smov 0  }
   0xd   :  { %s2536_s13 = smov 0   ;;  %s2538_s14 = smov 0  }
   0xe   :  { %s2540_s15 = smov 0   ;;  %s2542_s16 = smov 0  }
   0xf LB: > { %3264 = sst [smem:[#allocation10_spill]] %s2439_s30  ;;  %s1892_s17 = sadd.s32 4294967295, %s2467_s16   ;;  %s2467_s16 = sphi %s2542_s16, %s26_s16   ;;  %s2463_s15 = sphi %s2540_s15, %s3303_s15   ;;  %s2459_s14 = sphi %s2538_s14, %s3302_s14   ;;  %s2455_s13 = sphi %s2536_s13, %s3301_s13   ;;  %s2451_s12 = sphi %s2534_s12, %s3300_s12   ;;  %s2447_s11 = sphi %s2532_s11, %s3299_s11   ;;  %s2443_s10 = sphi %s2530_s10, %s3298_s10   ;;  %s2439_s30 = sphi %s2528_s30, %s3297_s30  }
  0x10   : > { %3265 = sst [smem:[#allocation11_spill]] %s2443_s10  ;;  %s1893_s18 = sadd.s32 4294967294, %s2467_s16  }
  0x11   : > { %3266 = sst [smem:[#allocation12_spill]] %s2447_s11  ;;  %s41_s19 = sadd.s32 1, %s2459_s14 }
  0x12   : > { %3267 = sst [smem:[#allocation13_spill]] %s2459_s14  ;;  %s45_s20 = sadd.s32 1, %s2463_s15 }
  0x13   : > { %3268 = sst [smem:[#allocation14_spill]] %s2463_s15  ;;  %p43_p0 = scmp.ge.s32.totalorder %s41_s19, 4 }
  0x14   : > { %3269 = sst [smem:[#allocation15_spill]] %s2467_s16  ;;  %s108_s21 = sadd.s32 1, %s2447_s11 }
  0x15   : > { %p115_p1 = scmp.ne.s32.totalorder %s2447_s11, %s2443_s10  ;;  %p116_p2 = scmp.eq.s32.totalorder %s2467_s16, 0 }
  0x16   : > { %s3305_s19 = smov (%p43_p0, %s41_s19), 0  ;;  %s3307_s20 = smov (!%p43_p0, %s45_s20), %s2463_s15 }
  0x17   : > { %3270 = sst [smem:[#allocation16_spill]] %s3305_s19  ;;  %s102_s22 = ssub.s32 %s2459_s14, %s3305_s19 }
  0x18   : > { %p2581_p3 = por %p116_p2, %p115_p1  ;;  %p47_p4 = scmp.ge.s32.totalorder %s3307_s20, 2 }
  0x19   : > { %p121_p5 = scmp.ne.s32.totalorder %s2443_s10, %s2439_s30  ;;  %p122_p6 = scmp.eq.s32.totalorder %s1892_s17, 0 }
  0x1a   : > { %p305_p7 = scmp.eq.s32.totalorder %s1892_s17, 7  ;;  %s3309_s20 = smov (%p47_p4, %s3307_s20), 0 }
  0x1b   : > { %3272 = sst [smem:[#allocation17_spill]] %s3309_s20  ;;  %p2589_p8 = por %p122_p6, %p121_p5 }
  0x1c   : > { %p2593_p9 = por %p305_p7, %p115_p1  ;;  %s101_s26 = ssub.s32 %s2463_s15, %s3309_s20 }
  0x1d   : > { %p311_p10 = scmp.eq.s32.totalorder %s1893_s18, 7  ;;  %s103_s27 = sor.u32 %s102_s22, %s101_s26 }
  0x1e   : > { %s3274_s25 = scalar_select %p2593_p9, 1, 0 }
  0x1f   : > { %p106_p11 = scmp.eq.s32.totalorder %s103_s27, 0  ;;  %p2599_p12 = por %p311_p10, %p121_p5 }
  0x20   : > { %3275 = sst [smem:[#allocation18_spill]] %s3274_s25  ;;  %p2182_p13 = scmp.lt.s32.totalorder %s2467_s16, 8 }
  0x21   : > { %s3276_s28 = scalar_select %p2599_p12, 1, 0 }
  0x22   : > { %s345_s29 = sand.u32 1, %s2447_s11   ;;  %s1897_s30 = sshll.u32 %s2459_s14, 4 }
  0x23   : > { %3277 = sst [smem:[#allocation19_spill]] %s3276_s28  ;;  %s1896_s19 = sshll.u32 %s345_s29, 7 }
  0x24   : > { %s2606_s17 = scalar_select %p106_p11, %s2447_s11, %s108_s21  }
  0x25   : > { %s1898_s9 = sshll.u32 %s2463_s15, 6  ;;  %s349_s8 = scalar_lea.vmem [#allocation4], %s1896_s19 }
  0x26   : > { %3278 = sst [smem:[#allocation20_spill]] %s2606_s17  ;;  %s360_s7 = sshll.u32 %s349_s8, 4  ;;  %s2610_s7 = int_to_ptr.vmem [resolvable:$true] %s360_s7 }
  0x27   : > { %s357_s6 = sadd.s32 %s1898_s9, %s1897_s30  ;;  %p2614_p0 = pnand %p2182_p13, %p2581_p3 }
  0x28   : > { %s1899_s20 = sshll.u32 %s357_s6, 7  ;;  %s3280_s2 = sld [smem:[#allocation23_spill]] }
  0x29   : > { %s2623_s8 = scalar_lea.sflag [#allocation5], %s345_s29  ;;  %p2341_p2 = pneg %p2614_p0 }
  0x2e   : > { %s2621_s21 = scalar_lea.hbm %s3280_s2, %s1899_s20  ;;  %s2344_s19 = scalar_lea.hbm %s3280_s2, 16384 }
  0x2f   : > { %s2339_s9 = scalar_lea.hbm %s2621_s21, 2048  ;;  %p2345_p5 = scmp.lt.u32.totalorder %s2621_s21, %s3280_s2 }
  0x30   : > { %p2340_p1 = scmp.ne.s32.totalorder %s2621_s21, %s2339_s9  ;;  %p2346_p6 = scmp.lt.u32.totalorder %s2344_s19, %s2339_s9 }
  0x31   : > { %p2348_p10 = scmp.lt.u32.totalorder %s2339_s9, %s2621_s21 }
  0x32   : > { %p2342_p3 = pnand %p2341_p2, %p2340_p1  ;;  %p2347_p7 = por %p2346_p6, %p2345_p5 }
  0x34   : > { %p2343_p4 = pneg %p2342_p3  ;;  %p2349_p11 = por %p2348_p10, %p2347_p7 }
  0x36   : > { %p2350_p13 = pnand %p2349_p11, %p2343_p4 }
  0x38   : > { %2353 = shalt.err (!%p2350_p13)
}
  0x39   : > { %s2354_s27 = scalar_lea.vmem %s2610_s7, 2048  ;;  %s2469_s29 = smov [#allocation4]  }
  0x3a   : > { %p2355_p1 = scmp.ne.s32.totalorder %s2610_s7, %s2354_s27  ;;  %s2359_s22 = sshll.u32 %s2469_s29, 4  ;;  %s2360_s22 = int_to_ptr.vmem [resolvable:$false] %s2359_s22 }
  0x3b   : > { %s2361_s26 = scalar_lea.vmem %s2360_s22, 4096  ;;  %p2362_p9 = scmp.lt.s32.totalorder %s2610_s7, %s2360_s22 }
  0x3c   : > { %p2357_p3 = pnand %p2355_p1, %p2341_p2  ;;  %p2363_p5 = scmp.lt.s32.totalorder %s2361_s26, %s2354_s27 }
  0x3e   : > { %p2358_p12 = pneg %p2357_p3  ;;  %p2364_p6 = por %p2363_p5, %p2362_p9 }
  0x40   : > { %p2365_p7 = pnand %p2364_p6, %p2358_p12 }
  0x42   : > { %2368 = shalt.err (!%p2365_p7)
}
  0x43   : > { %s2470_s9 = smov 128   ;;  %s2471_s6 = smov 8  }
  0x44   : > { %2177 = dma.hbm_to_vmem [thread:$0]  (!%p2614_p0), %s2621_s21, 2048, %s2610_s7, %s2623_s8, %s2470_s9, %s2470_s9, %s2471_s6  }
  0x45   : > { %p1900_p2 = scmp.ge.s32.totalorder %s2467_s16, 1  ;;  %p403_p4 = scmp.lt.s32.totalorder %s2467_s16, 9 }
  0x47   : > { %p404_p10 = pnand %p1900_p2, %p403_p4 }
  0x49   : > { %407 = sbr.rel (%p404_p10) target bundleno = 1419 (0x58b), region = 52 }
  0x50   : > { %s2654_s30 = sand.u32 1, %s2443_s10  }
  0x51   : > { %3281 = sst [smem:[#allocation21_spill]] %s2654_s30  ;;  %s1901_s19 = sshll.u32 %s2654_s30, 7 }
  0x52   : > { %s410_s20 = scalar_lea.sflag [#allocation5], %s2654_s30  ;;  %s2658_s23 = scalar_lea.vmem [#allocation4], %s1901_s19 }
  0x53   : > { %2430 = dma.done.wait (%p2589_p8), %s410_s20, 2048  }
  0x54   : > { %2432 = vsyncadd (%p2589_p8), %s410_s20, 4294965248  ;;  %p481_p9 = scmp.lt.s32.totalorder %s2455_s13, 1  ;;  %p490_p12 = scmp.lt.s32.totalorder %s2451_s12, 3 }
  0x55   : > { %p517_p0 = scmp.eq.s32.totalorder %s2451_s12, 0  ;;  %s3282_s0 = sld [smem:[#allocation22_spill]] }
  0x56   : > { %s2668_s7 = scalar_select %p481_p9, %s2455_s13, 1 }
  0x57   : > { %s2671_s18 = scalar_select %p490_p12, %s2451_s12, 3 }
  0x58   : > { %s1973_s24 = sshll.u32 %s2668_s7, 6  ;;  %s3283_s3 = sld [smem:[#allocation24_spill]]  ;;  %vm523_vm0 = vcmask (%p517_p0), 261120   ;;  %v2472_v0 = vmov (%p517_p0), 0.0  }
  0x59   : > { %s1974_s9 = sshll.u32 %s2671_s18, 4  ;;  %s497_s17 = scalar_lea.vmem %s3235_s4, %s2671_s18 }
  0x5a   : > { %s502_s21 = scalar_lea.vmem %s3236_s5, %s1974_s9  ;;  %s3284_s28 = sld [smem:[#allocation25_spill]] }
  0x5b   : > { %s2681_s26 = scalar_lea.vmem %s3282_s0, %s1973_s24  ;;  %s1909_s24 = sshll.u32 %s2671_s18, 2 }
  0x5c   : > { %s1976_s22 = sshll.u32 %s2668_s7, 7  ;;  %s3285_s25 = sld [smem:[#allocation26_spill]] }
  0x5d   : > { %s3286_s30 = sld [smem:[#allocation27_spill]]  ;;  %s2712_s15 = scalar_lea.vmem [#allocation7], %s1901_s19 }
  0x5e   : > { %s2687_s2 = scalar_lea.vmem %s3283_s3, %s1974_s9  ;;  %522 = sbr.rel (!%p517_p0) target bundleno = 108 (0x6c), region = 60 }
  0x60   : > { %s505_s29 = scalar_lea.vmem %s3284_s28, %s2671_s18 }
  0x62   : > { %s2705_s6 = scalar_lea.vmem %s3285_s25, %s1909_s24 }
  0x63   : > { %s2710_s14 = scalar_lea.vmem %s3286_s30, %s1976_s22 }
  0x64   : > { %524 = vst.msk [vmem:[%s2710_s14] sm:$0xff] (%p517_p0), %vm523_vm0, %v2472_v0  ;;  %525 = vst.msk [vmem:[%s2710_s14 + $0x8] sm:$0xff] (%p517_p0), %vm523_vm0, %v2472_v0 }
  0x65   : > { %526 = vst.msk [vmem:[%s2710_s14 + $0x10] sm:$0xff] %vm523_vm0, %v2472_v0  ;;  %527 = vst.msk [vmem:[%s2710_s14 + $0x18] sm:$0xff] %vm523_vm0, %v2472_v0 }
  0x66   : > { %528 = vst.msk [vmem:[%s2710_s14 + $0x20] sm:$0xff] %vm523_vm0, %v2472_v0  ;;  %529 = vst.msk [vmem:[%s2710_s14 + $0x28] sm:$0xff] %vm523_vm0, %v2472_v0 }
  0x67   : > { %530 = vst.msk [vmem:[%s2710_s14 + $0x30] sm:$0xff] %vm523_vm0, %v2472_v0  ;;  %531 = vst.msk [vmem:[%s2710_s14 + $0x38] sm:$0xff] %vm523_vm0, %v2472_v0 }
  0x68   : > { %532 = vst.msk [vmem:[%s2710_s14 + $0x40] sm:$0xff] %vm523_vm0, %v2472_v0  ;;  %533 = vst.msk [vmem:[%s2710_s14 + $0x48] sm:$0xff] %vm523_vm0, %v2472_v0 }
  0x69   : > { %534 = vst.msk [vmem:[%s2710_s14 + $0x50] sm:$0xff] %vm523_vm0, %v2472_v0  ;;  %535 = vst.msk [vmem:[%s2710_s14 + $0x58] sm:$0xff] %vm523_vm0, %v2472_v0 }
  0x6a   : > { %536 = vst.msk [vmem:[%s2710_s14 + $0x60] sm:$0xff] %vm523_vm0, %v2472_v0  ;;  %537 = vst.msk [vmem:[%s2710_s14 + $0x68] sm:$0xff] %vm523_vm0, %v2472_v0 }
  0x6b   : > { %538 = vst.msk [vmem:[%s2710_s14 + $0x70] sm:$0xff] %vm523_vm0, %v2472_v0  ;;  %539 = vst.msk [vmem:[%s2710_s14 + $0x78] sm:$0xff] %vm523_vm0, %v2472_v0 }
  0x6c PF: > { %v2255_v1 = vld [vmem:[%s502_s21] sm:$0xff]   ;;  %v2256_v2 = vld [vmem:[%s502_s21 + $0x8] sm:$0xff]   ;;  %vm622_vm1 = vcmask 261120   ;;  %v2259_v5 = vld [vmem:[%s2681_s26 + $0x10] sm:$0xff]   ;;  %vm752_vm2 = vcmask 64512   ;;  %s2473_s10 = smov 120  }
  0x6d   : > { %2039 = vmatprep.subr.bf16.mxu0 %v2255_v1  ;;  %v2257_v3 = vld [vmem:[%s2681_s26] sm:$0xff]   ;;  %v2258_v4 = vld [vmem:[%s2681_s26 + $0x8] sm:$0xff]   ;;  %v2260_v9 = vld [vmem:[%s2681_s26 + $0x18] sm:$0xff]   ;;  %vm1532_vm5 = vcmask 1043456   ;;  %s3289_s30 = sld [smem:[#allocation21_spill]]  ;;  %s3290_s19 = sld [smem:[#allocation18_spill]] }
  0x6e   : > { %2040 = vmatpush3.bf16.msra.mxu0 %v2255_v1  ;;  %2043 = vmatprep.mubr.msk.bf16.mxu0 %vm622_vm1, %v2257_v3  ;;  %v2265_v6 = vld [vmem:[%s2687_s2] sm:$0xff]   ;;  %v2266_v7 = vld [vmem:[%s2687_s2 + $0x8] sm:$0xff]   ;;  %v2269_v12 = vld [vmem:[%s2681_s26 + $0x10] sm:$0xff]   ;;  %s3291_s8 = sld [smem:[#allocation28_spill]] }
  0x6f   : > { %2041 = vmatprep.subr.bf16.mxu0 %v2256_v2  ;;  %2059 = vmatprep.subr.bf16.mxu1 %v2265_v6  ;;  %v2267_v8 = vld [vmem:[%s2681_s26] sm:$0xff]   ;;  %v2268_v11 = vld [vmem:[%s2681_s26 + $0x8] sm:$0xff]   ;;  %v2263_v14 = vld [vmem:[%s2681_s26 + $0x30] sm:$0xff]  }
  0x70   : > { %2060 = vmatpush3.bf16.msra.mxu1 %v2265_v6  ;;  %2063 = vmatprep.mubr.msk.bf16.mxu1 %vm622_vm1, %v2267_v8  ;;  %v2261_v10 = vld [vmem:[%s2681_s26 + $0x20] sm:$0xff]   ;;  %v2262_v13 = vld [vmem:[%s2681_s26 + $0x28] sm:$0xff]   ;;  %v2270_v15 = vld [vmem:[%s2681_s26 + $0x18] sm:$0xff]  }
  0x71   : > { %2061 = vmatprep.subr.bf16.mxu1 %v2266_v7  ;;  %v2271_v16 = vld [vmem:[%s2681_s26 + $0x20] sm:$0xff]   ;;  %v2264_v17 = vld [vmem:[%s2681_s26 + $0x38] sm:$0xff]   ;;  %v2272_v18 = vld [vmem:[%s2681_s26 + $0x28] sm:$0xff]  }
  0x72   : > { %2042 = vmatpush3.bf16.msra.mxu0 %v2256_v2  ;;  %v2273_v19 = vld [vmem:[%s2681_s26 + $0x30] sm:$0xff]   ;;  %v2274_v20 = vld [vmem:[%s2681_s26 + $0x38] sm:$0xff]   ;;  %v2787_v22 = vld [vmem:[%s505_s29] ss:$0 sm:$0xff]  ;;  %s1691_s26 = sshll.u32 %s2712_s15, 4  ;;  %s3129_s26 = int_to_ptr.vmem [resolvable:$true] %s1691_s26 }
  0x73   : > { %v2802_v33 = vld [vmem:[%s497_s17] ss:$0 sm:$0xff]  ;;  %s3288_s17 = scalar_lea.vmem %s3232_s1, %s2668_s7  ;;  %s1969_s7 = sshll.u32 %s2455_s13, 6 }
  0x74   : > { %2062 = vmatpush3.bf16.msra.mxu1 %v2266_v7  ;;  %s1671_s24 = scalar_lea.sflag [#allocation6], %s3289_s30  ;;  %s2369_s22 = scalar_lea.vmem %s3129_s26, 2048 }
  0x75   : > { %2044 = vmatmul.mubr.msk.bf16.vlgmr.msra.gmra.mrb[0].mxu0 %vm622_vm1, %v2258_v4  ;;  %p2370_p8 = scmp.ne.s32.totalorder %s3129_s26, %s2369_s22  ;;  %p3292_p11 = scmp.ne.s32.totalorder %s3290_s19, 0 }
  0x76   : > { %2047 = vmatprep.mubr.msk.bf16.mxu0 %vm622_vm1, %v2259_v5 }
  0x77   : > { %2064 = vmatmul.mubr.msk.bf16.vlgmr.msra.gmra.mrb[0].mxu1 %vm622_vm1, %v2268_v11  ;;  %p2371_p13 = pnand %p2370_p8, %p3292_p11 }
  0x78   : > { %2067 = vmatprep.mubr.msk.bf16.mxu1 %vm622_vm1, %v2269_v12 }
  0x79   : > { %p2372_p1 = pneg %p2371_p13 }
  0x7d   : > { %2048 = vmatmul.mubr.msk.bf16.gmra.mrb[4].mxu0 %vm622_vm1, %v2260_v9 }
  0x7e   : > { %2051 = vmatprep.mubr.msk.bf16.mxu0 %vm622_vm1, %v2261_v10 }
  0x7f   : > { %2068 = vmatmul.mubr.msk.bf16.gmra.mrb[4].mxu1 %vm622_vm1, %v2270_v15 }
  0x80   : > { %2071 = vmatprep.mubr.msk.bf16.mxu1 %vm622_vm1, %v2271_v16 }
  0x85   : > { %2052 = vmatmul.mubr.msk.bf16.gmra.mrb[8].mxu0 %vm622_vm1, %v2262_v13 }
  0x86   : > { %2055 = vmatprep.mubr.msk.bf16.mxu0 %vm622_vm1, %v2263_v14 }
  0x87   : > { %2072 = vmatmul.mubr.msk.bf16.gmra.mrb[8].mxu1 %vm622_vm1, %v2272_v18 }
  0x88   : > { %2075 = vmatprep.mubr.msk.bf16.mxu1 %vm622_vm1, %v2273_v19 }
  0x8d   : > { %2056 = vmatmul.mubr.msk.bf16.gmra.mrb[12].mxu0 %vm622_vm1, %v2264_v17 }
  0x8f   : > { %2076 = vmatmul.mubr.msk.bf16.gmra.mrb[12].mxu1 %vm622_vm1, %v2274_v20 }
 0x148   : > { %v2045_v21 = vpop.f32.mrb[0].mxu0 }
 0x149   : > { %v681_v23 = vpop.f32.mrb[1].mxu0  ;;  %v690_v25 = vadd.f32 %v2045_v21, %v2787_v22 }
 0x14a   : > { %v2046_v24 = vpop.f32.mrb[2].mxu0  ;;  %v682_v28 = vadd.f32 %v2787_v22, %v681_v23  ;;  %v2065_v38 = vpop.f32.mrb[0].mxu1 }
 0x14b   : > { %v693_v26 = vadd.f32 %v2046_v24, %v2787_v22  ;;  %v684_v27 = vpop.f32.mrb[3].mxu0  ;;  %v2808_v41 = vadd.f32 %v2065_v38, %v2802_v33  ;;  %v944_v42 = vpop.f32.mrb[1].mxu1 }
 0x14c   : > { %v685_v29 = vadd.f32 %v2787_v22, %v684_v27  ;;  %v945_v44 = vadd.f32 %v2802_v33, %v944_v42  ;;  %v2066_v45 = vpop.f32.mrb[2].mxu1 }
 0x14d   : > { %v745_v30 = vpack.c.bf16 %v693_v26, %v690_v25  ;;  %v2813_v47 = vadd.f32 %v2066_v45, %v2802_v33  ;;  %v947_v48 = vpop.f32.mrb[3].mxu1 }
 0x14e   : > { %v744_v31 = vpack.c.bf16 %v685_v29, %v682_v28  ;;  %v948_v50 = vadd.f32 %v2802_v33, %v947_v48 }
 0x14f   : > { %771 = vrot.lane.b32.xlu1 %v745_v30, %s2473_s10  ;;  %754 = vst.msk [vmem:[#allocation2 + $0x8] sm:$0xff] %vm752_vm2, %v745_v30  ;;  %v1008_v52 = vpack.c.bf16 %v2813_v47, %v2808_v41 }
 0x150   : > { %v2049_v32 = vpop.f32.mrb[4].mxu0  ;;  %769 = vrot.lane.b32.xlu0 %v744_v31, %s2473_s10  ;;  %753 = vst.msk [vmem:[#allocation2] sm:$0xff] %vm752_vm2, %v744_v31  ;;  %v1007_v55 = vpack.c.bf16 %v948_v50, %v945_v44 }
 0x151   : > { %v706_v34 = vadd.f32 %v2049_v32, %v2787_v22  ;;  %v697_v35 = vpop.f32.mrb[5].mxu0 }
 0x152   : > { %v698_v36 = vadd.f32 %v2787_v22, %v697_v35  ;;  %v2050_v37 = vpop.f32.mrb[6].mxu0  ;;  %2095 = vmatprep.mubr.msk.bf16.mxu0 %vm752_vm2, %v1007_v55  ;;  %v2069_v61 = vpop.f32.mrb[4].mxu1 }
 0x153   : > { %v709_v39 = vadd.f32 %v2050_v37, %v2787_v22  ;;  %v700_v40 = vpop.f32.mrb[7].mxu0  ;;  %v2830_v0 = vadd.f32 %v2069_v61, %v2802_v33  ;;  %v960_v1 = vpop.f32.mrb[5].mxu1 }
 0x154   : > { %v701_v43 = vadd.f32 %v2787_v22, %v700_v40  ;;  %v2834_v3 = vadd.f32 %v2802_v33, %v960_v1  ;;  %v2070_v4 = vpop.f32.mrb[6].mxu1  ;;  %v1204_v1 = vlaneseq }
 0x155   : > { %v747_v46 = vpack.c.bf16 %v709_v39, %v706_v34  ;;  %v2839_v6 = vadd.f32 %v2070_v4, %v2802_v33  ;;  %v963_v7 = vpop.f32.mrb[7].mxu1 }
 0x156   : > { %v746_v49 = vpack.c.bf16 %v701_v43, %v698_v36  ;;  %v1016_v56 = vld [vmem:[#allocation2 + $0x8] sm:$0xff]  ;;  %v2842_v9 = vadd.f32 %v2802_v33, %v963_v7 }
 0x157   : > { %756 = vst.msk [vmem:[#allocation2 + $0x18] sm:$0xff] %vm752_vm2, %v747_v46  ;;  %775 = vrot.lane.b32.xlu1 %v747_v46, %s2473_s10  ;;  %v1015_v51 = vld [vmem:[#allocation2] sm:$0xff]  ;;  %v1010_v11 = vpack.c.bf16 %v2839_v6, %v2830_v0  ;;  %v1068_v12 = vsel %vm752_vm2, %v1016_v56, 0  ;;  %v2474_v6 = vmov 0  }
 0x158   : > { %755 = vst.msk [vmem:[#allocation2 + $0x10] sm:$0xff] %vm752_vm2, %v746_v49  ;;  %2161 = vmatprep.subr.msk.bf16.mxu0 %vm752_vm2, %v1015_v51  ;;  %v1065_v53 = vsel %vm752_vm2, %v1015_v51, 0  ;;  %v2053_v54 = vpop.f32.mrb[8].mxu0  ;;  %v1009_v14 = vpack.c.bf16 %v2842_v9, %v2834_v3  ;;  %v1205_v3 = vshrl.u32 %v1204_v1, 7  ;;  %v1025_v9 = vld [vmem:[%s2658_s23 + $0x10] sm:$0xff]  ;;  %v1036_v1 = vld [vmem:[%s2658_s23 + $0x68] sm:$0xff] }
 0x159   : > { %2080 = vmatpush3.bf16.xpose.msra.mxu0 %v1065_v53  ;;  %v722_v57 = vadd.f32 %v2053_v54, %v2787_v22  ;;  %v713_v58 = vpop.f32.mrb[9].mxu0 }
 0x15a   : > { %2162 = vmatprep.subr.msk.bf16.mxu0 %vm752_vm2, %v1016_v56  ;;  %v714_v59 = vadd.f32 %v2787_v22, %v713_v58  ;;  %v2054_v60 = vpop.f32.mrb[10].mxu0  ;;  %v2073_v19 = vpop.f32.mrb[8].mxu1  ;;  %v1206_v4 = vsub.s32 0, %v1205_v3 }
 0x15b   : > { %773 = vrot.lane.b32.xlu1 %v746_v49, %s2473_s10  ;;  %v725_v62 = vadd.f32 %v2054_v60, %v2787_v22  ;;  %v716_v63 = vpop.f32.mrb[11].mxu0  ;;  %v985_v23 = vadd.f32 %v2073_v19, %v2802_v33  ;;  %v976_v24 = vpop.f32.mrb[9].mxu1 }
 0x15c   : > { %v717_v2 = vadd.f32 %v2787_v22, %v716_v63  ;;  %v977_v26 = vadd.f32 %v2802_v33, %v976_v24  ;;  %v2074_v27 = vpop.f32.mrb[10].mxu1  ;;  %v1029_v24 = vld [vmem:[%s2658_s23 + $0x30] sm:$0xff] }
 0x15d   : > { %v2836_v5 = vpack.c.bf16 %v725_v62, %v722_v57  ;;  %v988_v29 = vadd.f32 %v2074_v27, %v2802_v33  ;;  %v979_v30 = vpop.f32.mrb[11].mxu1 }
 0x15e   : > { %v748_v8 = vpack.c.bf16 %v717_v2, %v714_v59  ;;  %v980_v32 = vadd.f32 %v2802_v33, %v979_v30  ;;  %v1018_v36 = vld [vmem:[#allocation2 + $0x18] sm:$0xff]  ;;  %v1201_v2 = vld [vmem:[%s3288_s17] sm:$0x1] }
 0x15f   : > { %v1017_v10 = vld [vmem:[#allocation2 + $0x10] sm:$0xff]  ;;  %758 = vst.msk [vmem:[#allocation2 + $0x28] sm:$0xff] %vm752_vm2, %v2836_v5  ;;  %v1012_v34 = vpack.c.bf16 %v988_v29, %v985_v23  ;;  %v1074_v49 = vsel %vm752_vm2, %v1018_v36, 0  ;;  %vm1202_vm3 = vcmp.eq.f32.partialorder %v1201_v2, 0.0  ;;  %v1030_v30 = vld [vmem:[%s2658_s23 + $0x38] sm:$0xff] }
 0x160   : > { %757 = vst.msk [vmem:[#allocation2 + $0x20] sm:$0xff] %vm752_vm2, %v748_v8  ;;  %777 = vrot.lane.b32.xlu0 %v748_v8, %s2473_s10  ;;  %v2057_v13 = vpop.f32.mrb[12].mxu0  ;;  %v1071_v35 = vsel %vm752_vm2, %v1017_v10, 0  ;;  %v1203_v7 = vsel %vm1202_vm3, 1, %v2474_v6 }
 0x161   : > { %2082 = vmatpush3.bf16.xpose.msra.mxu0 %v1068_v12  ;;  %v738_v15 = vadd.f32 %v2057_v13, %v2787_v22  ;;  %v729_v16 = vpop.f32.mrb[13].mxu0  ;;  %v2908_v8 = vrot.slane %v1203_v7, %v1206_v4  ;;  %v1026_v12 = vld [vmem:[%s2658_s23 + $0x18] sm:$0xff] }
 0x162   : > { %2163 = vmatprep.subr.msk.bf16.mxu0 %vm752_vm2, %v1017_v10  ;;  %v730_v17 = vadd.f32 %v2787_v22, %v729_v16  ;;  %v2058_v18 = vpop.f32.mrb[14].mxu0  ;;  %v2077_v37 = vpop.f32.mrb[12].mxu1  ;;  %v1023_v10 = vld [vmem:[%s2658_s23] sm:$0xff] }
 0x163   : > { %v741_v20 = vadd.f32 %v2058_v18, %v2787_v22  ;;  %v732_v21 = vpop.f32.mrb[15].mxu0  ;;  %v1001_v38 = vadd.f32 %v2077_v37, %v2802_v33  ;;  %v992_v39 = vpop.f32.mrb[13].mxu1  ;;  %vm1208_vm4 = vcmp.eq.s32.totalorder %v2908_v8, 1 }
 0x164   : > { %v733_v25 = vadd.f32 %v2787_v22, %v732_v21  ;;  %v1011_v22 = vpack.c.bf16 %v980_v32, %v977_v26  ;;  %v993_v40 = vadd.f32 %v2802_v33, %v992_v39  ;;  %v2078_v42 = vpop.f32.mrb[14].mxu1  ;;  %v1027_v26 = vld [vmem:[%s2658_s23 + $0x20] sm:$0xff] }
 0x165   : > { %v2860_v28 = vpack.c.bf16 %v741_v20, %v738_v15  ;;  %v1004_v43 = vadd.f32 %v2078_v42, %v2802_v33  ;;  %v995_v44 = vpop.f32.mrb[15].mxu1  ;;  %v1024_v15 = vld [vmem:[%s2658_s23 + $0x8] sm:$0xff] }
 0x166   : > { %v2863_v31 = vpack.c.bf16 %v733_v25, %v730_v17  ;;  %v996_v45 = vadd.f32 %v2802_v33, %v995_v44  ;;  %v1020_v53 = vld [vmem:[#allocation2 + $0x28] sm:$0xff]  ;;  %v1031_v44 = vld [vmem:[%s2658_s23 + $0x40] sm:$0xff] }
 0x167   : > { %760 = vst.msk [vmem:[#allocation2 + $0x38] sm:$0xff] %vm752_vm2, %v2860_v28  ;;  %v1019_v46 = vld [vmem:[#allocation2 + $0x20] sm:$0xff]  ;;  %v1014_v48 = vpack.c.bf16 %v1004_v43, %v1001_v38  ;;  %v1080_v55 = vsel %vm752_vm2, %v1020_v53, 0  ;;  %v1033_v43 = vld [vmem:[%s2658_s23 + $0x50] sm:$0xff] }
 0x168   : > { %759 = vst.msk [vmem:[#allocation2 + $0x30] sm:$0xff] %vm752_vm2, %v2863_v31  ;;  %v1013_v50 = vpack.c.bf16 %v996_v45, %v993_v40  ;;  %v1077_v51 = vsel %vm752_vm2, %v1019_v46, 0 }
 0x169   : > { %2084 = vmatpush3.bf16.xpose.msra.mxu0 %v1071_v35  ;;  %v1028_v35 = vld [vmem:[%s2658_s23 + $0x28] sm:$0xff] }
 0x16a   : > { %2164 = vmatprep.subr.msk.bf16.mxu0 %vm752_vm2, %v1018_v36 }
 0x16e   : > { %v1022_v56 = vld [vmem:[#allocation2 + $0x38] sm:$0xff] }
 0x16f   : > { %v1021_v54 = vld [vmem:[#allocation2 + $0x30] sm:$0xff]  ;;  %v1086_v57 = vsel %vm752_vm2, %v1022_v56, 0 }
 0x170   : > { %v1083_v33 = vsel %vm752_vm2, %v1021_v54, 0 }
 0x171   : > { %2086 = vmatpush3.bf16.xpose.msra.mxu0 %v1074_v49 }
 0x172   : > { %2165 = vmatprep.subr.msk.bf16.mxu0 %vm752_vm2, %v1019_v46 }
 0x179   : > { %2088 = vmatpush3.bf16.xpose.msra.mxu0 %v1077_v51 }
 0x17a   : > { %2166 = vmatprep.subr.msk.bf16.mxu0 %vm752_vm2, %v1020_v53  ;;  %v1032_v53 = vld [vmem:[%s2658_s23 + $0x48] sm:$0xff] }
 0x181   : > { %2090 = vmatpush3.bf16.xpose.msra.mxu0 %v1080_v55 }
 0x182   : > { %2167 = vmatprep.subr.msk.bf16.mxu0 %vm752_vm2, %v1021_v54 }
 0x189   : > { %2092 = vmatpush3.bf16.xpose.msra.mxu0 %v1083_v33 }
 0x18a   : > { %2168 = vmatprep.subr.msk.bf16.mxu0 %vm752_vm2, %v1022_v56 }
 0x191   : > { %2094 = vmatpush3.bf16.xpose.msra.mxu0 %v1086_v57 }
 0x198   : > { %2096 = vmatmul.mubr.msk.bf16.vlgmr.msra.gmra.mrb[16].mxu0 %vm752_vm2, %v1008_v52 }
 0x199   : > { %2099 = vmatprep.mubr.msk.bf16.mxu0 %vm752_vm2, %v1009_v14 }
 0x1a0   : > { %2100 = vmatmul.mubr.msk.bf16.gmra.mrb[20].mxu0 %vm752_vm2, %v1010_v11 }
 0x1a1   : > { %2103 = vmatprep.mubr.msk.bf16.mxu0 %vm752_vm2, %v1011_v22 }
 0x1a8   : > { %2104 = vmatmul.mubr.msk.bf16.gmra.mrb[24].mxu0 %vm752_vm2, %v1012_v34 }
 0x1a9   : > { %2107 = vmatprep.mubr.msk.bf16.mxu0 %vm752_vm2, %v1013_v50 }
 0x1b0   : > { %2108 = vmatmul.mubr.msk.bf16.gmra.mrb[28].mxu0 %vm752_vm2, %v1014_v48  ;;  %v1034_v48 = vld [vmem:[%s2658_s23 + $0x58] sm:$0xff] }
 0x1c1   : > { %v772_v58 = vpop.permute.xlu1 %771 }
 0x1c2   : > { %794 = vst.msk [vmem:[#allocation3 + $0x8] sm:$0xff] %vm752_vm2, %v772_v58  ;;  %v770_v41 = vpop.permute.xlu0 %769 }
 0x1c3   : > { %793 = vst.msk [vmem:[#allocation3] sm:$0xff] %vm752_vm2, %v770_v41 }
 0x1c9   : > { %v776_v47 = vpop.permute.xlu1 %775  ;;  %v1378_v59 = vld [vmem:[#allocation3 + $0x8] sm:$0xff] }
 0x1ca   : > { %796 = vst.msk [vmem:[#allocation3 + $0x18] sm:$0xff] %vm752_vm2, %v776_v47  ;;  %v1377_v52 = vld [vmem:[#allocation3] sm:$0xff]  ;;  %v1037_v47 = vld [vmem:[%s2658_s23 + $0x70] sm:$0xff] }
 0x1cb   : > { %2111 = vmatprep.subr.bf16.mxu1 %v1377_v52 }
 0x1cc   : > { %2112 = vmatpush3.bf16.msra.mxu1 %v1377_v52  ;;  %v1035_v52 = vld [vmem:[%s2658_s23 + $0x60] sm:$0xff] }
 0x1cd   : > { %v774_v60 = vpop.permute.xlu1 %773  ;;  %2113 = vmatprep.subr.bf16.mxu1 %v1378_v59 }
 0x1ce   : > { %795 = vst.msk [vmem:[#allocation3 + $0x10] sm:$0xff] %vm752_vm2, %v774_v60 }
 0x1d0   : > { %2114 = vmatpush3.bf16.msra.mxu1 %v1378_v59 }
 0x1d1   : > { %v1380_v63 = vld [vmem:[#allocation3 + $0x18] sm:$0xff] }
 0x1d2   : > { %v778_v61 = vpop.permute.xlu0 %777 }
 0x1d3   : > { %797 = vst.msk [vmem:[#allocation3 + $0x20] sm:$0xff] %vm752_vm2, %v778_v61  ;;  %v1038_v61 = vld [vmem:[%s2658_s23 + $0x78] sm:$0xff]  ;;  %s1968_s23 = sshll.u32 %s2451_s12, 4  ;;  %s2475_s12 = smov [#allocation7]  }
 0x1d4   : > { %s1688_s18 = sadd.s32 %s1969_s7, %s1968_s23  ;;  %s2373_s13 = sshll.u32 %s2475_s12, 4  ;;  %s2374_s13 = int_to_ptr.vmem [resolvable:$false] %s2373_s13 }
 0x1d5   : > { %v1379_v62 = vld [vmem:[#allocation3 + $0x10] sm:$0xff]  ;;  %s1970_s27 = sshll.u32 %s1688_s18, 7  ;;  %p2376_p3 = scmp.lt.s32.totalorder %s3129_s26, %s2374_s13 }
 0x1d6   : > { %2115 = vmatprep.subr.bf16.mxu1 %v1379_v62  ;;  %s3127_s29 = scalar_lea.hbm %s3291_s8, %s1970_s27 }
 0x1d7   : > { %2116 = vmatpush3.bf16.msra.mxu1 %v1379_v62 }
 0x1d8   : > { %2117 = vmatprep.subr.bf16.mxu1 %v1380_v63 }
 0x1da   : > { %v1381_v0 = vld [vmem:[#allocation3 + $0x20] sm:$0xff] }
 0x1db   : > { %2118 = vmatpush3.bf16.msra.mxu1 %v1380_v63 }
 0x1dc   : > { %2119 = vmatprep.subr.bf16.mxu1 %v1381_v0 }
 0x1df   : > { %2120 = vmatpush3.bf16.msra.mxu1 %v1381_v0 }
 0x26b   : > { %v2097_v11 = vpop.f32.mrb[16].mxu0 }
 0x26c   : > { %v1131_v13 = vadd.f32 %v2097_v11, %v1025_v9  ;;  %v1122_v14 = vpop.f32.mrb[17].mxu0 }
 0x26d   : > { %v1123_v16 = vadd.f32 %v1122_v14, %v1023_v10  ;;  %v2098_v17 = vpop.f32.mrb[18].mxu0 }
 0x26e   : > { %1187 = vst [vmem:[%s2712_s15 + $0x10] sm:$0xff] %v1131_v13  ;;  %v1134_v18 = vadd.f32 %v2098_v17, %v1026_v12  ;;  %v1125_v19 = vpop.f32.mrb[19].mxu0  ;;  %v2918_v20 = vsel %vm1208_vm4, -1e+09, %v1131_v13 }
 0x26f   : > { %1185 = vst [vmem:[%s2712_s15] sm:$0xff] %v1123_v16  ;;  %v1126_v21 = vadd.f32 %v1125_v19, %v1024_v15  ;;  %1229 = vmax.xlane.f32.xlu1 %v2918_v20  ;;  %v2924_v23 = vsel %vm1208_vm4, -1e+09, %v1123_v16 }
 0x270   : > { %1188 = vst [vmem:[%s2712_s15 + $0x18] sm:$0xff] %v1134_v18  ;;  %1225 = vmax.xlane.f32.xlu0 %v2924_v23  ;;  %v2932_v25 = vsel %vm1208_vm4, -1e+09, %v1134_v18 }
 0x271   : > { %1186 = vst [vmem:[%s2712_s15 + $0x8] sm:$0xff] %v1126_v21  ;;  %v2938_v29 = vsel %vm1208_vm4, -1e+09, %v1126_v21 }
 0x273   : > { %1231 = vmax.xlane.f32.xlu1 %v2932_v25  ;;  %v2101_v27 = vpop.f32.mrb[20].mxu0 }
 0x274   : > { %v1147_v32 = vadd.f32 %v2101_v27, %v1029_v24  ;;  %v1138_v34 = vpop.f32.mrb[21].mxu0  ;;  %1227 = vmax.xlane.f32.xlu0 %v2938_v29 }
 0x275   : > { %v1139_v22 = vadd.f32 %v1138_v34, %v1027_v26  ;;  %v2102_v36 = vpop.f32.mrb[22].mxu0 }
 0x276   : > { %1191 = vst [vmem:[%s2712_s15 + $0x30] sm:$0xff] %v1147_v32  ;;  %v1150_v37 = vadd.f32 %v2102_v36, %v1030_v30  ;;  %v1141_v38 = vpop.f32.mrb[23].mxu0  ;;  %v2946_v39 = vsel %vm1208_vm4, -1e+09, %v1147_v32 }
 0x277   : > { %1189 = vst [vmem:[%s2712_s15 + $0x20] sm:$0xff] %v1139_v22  ;;  %v1142_v40 = vadd.f32 %v1141_v38, %v1028_v35  ;;  %v2961_v46 = vsel %vm1208_vm4, -1e+09, %v1139_v22 }
 0x278   : > { %1192 = vst [vmem:[%s2712_s15 + $0x38] sm:$0xff] %v1150_v37  ;;  %1237 = vmax.xlane.f32.xlu0 %v2946_v39  ;;  %v2953_v42 = vsel %vm1208_vm4, -1e+09, %v1150_v37 }
 0x279   : > { %1190 = vst [vmem:[%s2712_s15 + $0x28] sm:$0xff] %v1142_v40  ;;  %1239 = vmax.xlane.f32.xlu1 %v2953_v42  ;;  %v2967_v51 = vsel %vm1208_vm4, -1e+09, %v1142_v40 }
 0x27b   : > { %v2105_v45 = vpop.f32.mrb[24].mxu0 }
 0x27c   : > { %v1163_v49 = vadd.f32 %v2105_v45, %v1033_v43  ;;  %v1154_v50 = vpop.f32.mrb[25].mxu0  ;;  %1233 = vmax.xlane.f32.xlu0 %v2961_v46 }
 0x27d   : > { %v1155_v54 = vadd.f32 %v1154_v50, %v1031_v44  ;;  %v2106_v55 = vpop.f32.mrb[26].mxu0  ;;  %1235 = vmax.xlane.f32.xlu1 %v2967_v51 }
 0x27e   : > { %1195 = vst [vmem:[%s2712_s15 + $0x50] sm:$0xff] %v1163_v49  ;;  %v1166_v33 = vadd.f32 %v2106_v55, %v1034_v48  ;;  %v1157_v56 = vpop.f32.mrb[27].mxu0  ;;  %v2974_v57 = vsel %vm1208_vm4, -1e+09, %v1163_v49 }
 0x27f   : > { %1193 = vst [vmem:[%s2712_s15 + $0x40] sm:$0xff] %v1155_v54  ;;  %v1158_v58 = vadd.f32 %v1157_v56, %v1032_v53  ;;  %v2989_v60 = vsel %vm1208_vm4, -1e+09, %v1155_v54 }
 0x280   : > { %1196 = vst [vmem:[%s2712_s15 + $0x58] sm:$0xff] %v1166_v33  ;;  %1245 = vmax.xlane.f32.xlu0 %v2974_v57  ;;  %v2981_v41 = vsel %vm1208_vm4, -1e+09, %v1166_v33 }
 0x281   : > { %1194 = vst [vmem:[%s2712_s15 + $0x48] sm:$0xff] %v1158_v58  ;;  %1247 = vmax.xlane.f32.xlu1 %v2981_v41  ;;  %v2995_v0 = vsel %vm1208_vm4, -1e+09, %v1158_v58 }
 0x283   : > { %v2109_v59 = vpop.f32.mrb[28].mxu0 }
 0x284   : > { %v1179_v62 = vadd.f32 %v2109_v59, %v1037_v47  ;;  %v1170_v63 = vpop.f32.mrb[29].mxu0  ;;  %1241 = vmax.xlane.f32.xlu0 %v2989_v60 }
 0x285   : > { %v1171_v2 = vadd.f32 %v1170_v63, %v1035_v52  ;;  %v2110_v3 = vpop.f32.mrb[30].mxu0  ;;  %1243 = vmax.xlane.f32.xlu1 %v2995_v0 }
 0x286   : > { %1199 = vst [vmem:[%s2712_s15 + $0x70] sm:$0xff] %v1179_v62  ;;  %v1182_v4 = vadd.f32 %v2110_v3, %v1038_v61  ;;  %v3002_v6 = vsel %vm1208_vm4, -1e+09, %v1179_v62  ;;  %v1173_v7 = vpop.f32.mrb[31].mxu0 }
 0x287   : > { %1197 = vst [vmem:[%s2712_s15 + $0x60] sm:$0xff] %v1171_v2  ;;  %v1174_v9 = vadd.f32 %v1173_v7, %v1036_v1  ;;  %v3015_v11 = vsel %vm1208_vm4, -1e+09, %v1171_v2 }
 0x288   : > { %1200 = vst [vmem:[%s2712_s15 + $0x78] sm:$0xff] %v1182_v4  ;;  %1253 = vmax.xlane.f32.xlu0 %v3002_v6  ;;  %v3009_v10 = vsel %vm1208_vm4, -1e+09, %v1182_v4 }
 0x289   : > { %1198 = vst [vmem:[%s2712_s15 + $0x68] sm:$0xff] %v1174_v9  ;;  %1255 = vmax.xlane.f32.xlu1 %v3009_v10  ;;  %v3019_v12 = vsel %vm1208_vm4, -1e+09, %v1174_v9 }
 0x28c   : > { %1249 = vmax.xlane.f32.xlu0 %v3015_v11 }
 0x28d   : > { %1251 = vmax.xlane.f32.xlu1 %v3019_v12 }
 0x29e   : > { %779 = vrot.lane.b32.xlu1 %v2836_v5, %s2473_s10 }
 0x2a2   : > { %781 = vrot.lane.b32.xlu0 %v2863_v31, %s2473_s10 }
 0x2fc   : > { %v1230_v13 = vpop.xlane.xlu1 %1229 }
 0x2fd   : > { %v1259_v14 = vsub.f32 %v2918_v20, %v1230_v13  ;;  %v1226_v15 = vpop.xlane.xlu0 %1225 }
 0x2fe   : > { %v1257_v16 = vsub.f32 %v2924_v23, %v1226_v15 }
 0x2ff   : > { %v1277_v17 = vmul.f32 1.442695, %v1259_v14 }
 0x300   : > { %v1273_v8 = vmul.f32 1.442695, %v1257_v16  ;;  %v1232_v18 = vpop.xlane.xlu1 %1231 }
 0x301   : > { %2275 = vpow2.f32 %v1277_v17  ;;  %v1260_v19 = vsub.f32 %v2932_v25, %v1232_v18  ;;  %v1228_v21 = vpop.xlane.xlu0 %1227 }
 0x302   : > { %2277 = vpow2.f32 %v1273_v8  ;;  %v1258_v24 = vsub.f32 %v2938_v29, %v1228_v21 }
 0x303   : > { %v1279_v5 = vmul.f32 1.442695, %v1260_v19 }
 0x304   : > { %v1275_v26 = vmul.f32 1.442695, %v1258_v24 }
 0x305   : > { %2279 = vpow2.f32 %v1279_v5  ;;  %v1238_v31 = vpop.xlane.xlu0 %1237 }
 0x306   : > { %v1263_v27 = vsub.f32 %v2946_v39, %v1238_v31  ;;  %v1240_v20 = vpop.xlane.xlu1 %1239  ;;  %2281 = vpow2.f32 %v1275_v26 }
 0x307   : > { %v1264_v30 = vsub.f32 %v2953_v42, %v1240_v20 }
 0x308   : > { %v1285_v23 = vmul.f32 1.442695, %v1263_v27 }
 0x309   : > { %v1287_v32 = vmul.f32 1.442695, %v1264_v30  ;;  %v1234_v34 = vpop.xlane.xlu0 %1233 }
 0x30a   : > { %2283 = vpow2.f32 %v1285_v23  ;;  %v1261_v25 = vsub.f32 %v2961_v46, %v1234_v34  ;;  %v1236_v35 = vpop.xlane.xlu1 %1235 }
 0x30b   : > { %v3034_v22 = vpop.eup %2275  ;;  %v1262_v29 = vsub.f32 %v2967_v51, %v1236_v35  ;;  %2285 = vpow2.f32 %v1287_v32 }
 0x30c   : > { %v3037_v36 = vpop.eup %2277  ;;  %v1281_v37 = vmul.f32 1.442695, %v1261_v25  ;;  %1309 = vadd.xlane.f32.xlu0 %v3034_v22 }
 0x30d   : > { %v1283_v38 = vmul.f32 1.442695, %v1262_v29  ;;  %1305 = vadd.xlane.f32.xlu1 %v3037_v36  ;;  %v1246_v39 = vpop.xlane.xlu0 %1245 }
 0x30e   : > { %2287 = vpow2.f32 %v1281_v37  ;;  %v1267_v40 = vsub.f32 %v2974_v57, %v1246_v39  ;;  %v1248_v42 = vpop.xlane.xlu1 %1247 }
 0x30f   : > { %v3042_v43 = vpop.eup %2279  ;;  %v1268_v44 = vsub.f32 %v2981_v41, %v1248_v42  ;;  %2289 = vpow2.f32 %v1283_v38 }
 0x310   : > { %v1293_v45 = vmul.f32 1.442695, %v1267_v40  ;;  %1311 = vadd.xlane.f32.xlu0 %v3042_v43  ;;  %v3047_v51 = vpop.eup %2281 }
 0x311   : > { %v1295_v46 = vmul.f32 1.442695, %v1268_v44  ;;  %v1242_v48 = vpop.xlane.xlu0 %1241 }
 0x312   : > { %2291 = vpow2.f32 %v1293_v45  ;;  %v1265_v49 = vsub.f32 %v2989_v60, %v1242_v48  ;;  %v1244_v50 = vpop.xlane.xlu1 %1243  ;;  %v1507_v48 = vld [vmem:[%s2705_s6] sm:$0xf]  ;;  %s2375_s6 = scalar_lea.vmem %s2374_s13, 4096 }
 0x313   : > { %v1266_v53 = vsub.f32 %v2995_v0, %v1244_v50  ;;  %2293 = vpow2.f32 %v1295_v46  ;;  %p2377_p5 = scmp.lt.s32.totalorder %s2375_s6, %s2369_s22 }
 0x314   : > { %v3050_v54 = vpop.eup %2283  ;;  %v1289_v55 = vmul.f32 1.442695, %v1265_v49  ;;  %1307 = vadd.xlane.f32.xlu0 %v3047_v51 }
 0x315   : > { %v1291_v33 = vmul.f32 1.442695, %v1266_v53  ;;  %1317 = vadd.xlane.f32.xlu1 %v3050_v54  ;;  %v1254_v56 = vpop.xlane.xlu0 %1253  ;;  %v3055_v41 = vpop.eup %2285  ;;  %p2378_p6 = por %p2377_p5, %p2376_p3 }
 0x316   : > { %2295 = vpow2.f32 %v1289_v55  ;;  %v1271_v57 = vsub.f32 %v3002_v6, %v1254_v56  ;;  %v1256_v58 = vpop.xlane.xlu1 %1255  ;;  %v1534_v55 = vsel %vm1532_vm5, %v1507_v48, 0 }
 0x317   : > { %2297 = vpow2.f32 %v1291_v33  ;;  %v1272_v7 = vsub.f32 %v3009_v10, %v1256_v58  ;;  %p2379_p7 = pnand %p2378_p6, %p2372_p1 }
 0x318   : > { %v3057_v47 = vpop.eup %2287  ;;  %1319 = vadd.xlane.f32.xlu0 %v3055_v41  ;;  %v1301_v52 = vmul.f32 1.442695, %v1271_v57 }
 0x319   : > { %1313 = vadd.xlane.f32.xlu1 %v3057_v47  ;;  %v1250_v59 = vpop.xlane.xlu0 %1249  ;;  %v3062_v62 = vpop.eup %2289 }
 0x31a   : > { %v1269_v60 = vsub.f32 %v3015_v11, %v1250_v59  ;;  %v1252_v61 = vpop.xlane.xlu1 %1251  ;;  %2299 = vpow2.f32 %v1301_v52 }
 0x31b   : > { %v1270_v1 = vsub.f32 %v3019_v12, %v1252_v61  ;;  %v1303_v12 = vmul.f32 1.442695, %v1272_v7 }
 0x31c   : > { %v3064_v63 = vpop.eup %2291  ;;  %1315 = vadd.xlane.f32.xlu0 %v3062_v62  ;;  %v1297_v0 = vmul.f32 1.442695, %v1269_v60 }
 0x31d   : > { %1325 = vadd.xlane.f32.xlu1 %v3064_v63  ;;  %v782_v2 = vpop.permute.xlu0 %781  ;;  %v3070_v4 = vpop.eup %2293  ;;  %v1299_v9 = vmul.f32 1.442695, %v1270_v1 }
 0x31e   : > { %799 = vst.msk [vmem:[#allocation3 + $0x30] sm:$0xff] %vm752_vm2, %v782_v2  ;;  %v780_v3 = vpop.permute.xlu1 %779  ;;  %2301 = vpow2.f32 %v1297_v0 }
 0x31f   : > { %798 = vst.msk [vmem:[#allocation3 + $0x28] sm:$0xff] %vm752_vm2, %v780_v3  ;;  %2303 = vpow2.f32 %v1299_v9 }
 0x320   : > { %v3073_v6 = vpop.eup %2295  ;;  %1327 = vadd.xlane.f32.xlu0 %v3070_v4  ;;  %2305 = vpow2.f32 %v1303_v12 }
 0x321   : > { %1321 = vadd.xlane.f32.xlu1 %v3073_v6  ;;  %v3078_v11 = vpop.eup %2297 }
 0x324   : > { %1323 = vadd.xlane.f32.xlu0 %v3078_v11  ;;  %v3081_v14 = vpop.eup %2299 }
 0x325   : > { %v1383_v15 = vld [vmem:[#allocation3 + $0x30] sm:$0xff] }
 0x326   : > { %v1382_v13 = vld [vmem:[#allocation3 + $0x28] sm:$0xff] }
 0x327   : > { %2121 = vmatprep.subr.bf16.mxu1 %v1382_v13 }
 0x328   : > { %2122 = vmatpush3.bf16.msra.mxu1 %v1382_v13  ;;  %1333 = vadd.xlane.f32.xlu0 %v3081_v14  ;;  %v3084_v10 = vpop.eup %2301 }
 0x329   : > { %2123 = vmatprep.subr.bf16.mxu1 %v1383_v15  ;;  %v3087_v16 = vpop.eup %2303 }
 0x32a   : > { %v3092_v17 = vpop.eup %2305 }
 0x32c   : > { %1329 = vadd.xlane.f32.xlu0 %v3084_v10  ;;  %2124 = vmatpush3.bf16.msra.mxu1 %v1383_v15 }
 0x330   : > { %1331 = vadd.xlane.f32.xlu0 %v3087_v16 }
 0x332   : > { %783 = vrot.lane.b32.xlu1 %v2860_v28, %s2473_s10 }
 0x334   : > { %1335 = vadd.xlane.f32.xlu0 %v3092_v17 }
 0x399   : > { %v1310_v8 = vpop.xlane.xlu0 %1309 }
 0x39a   : > { %v1306_v18 = vpop.xlane.xlu1 %1305 }
 0x39b   : > { %2307 = vrcp.f32 %v1306_v18 }
 0x39d   : > { %v1312_v19 = vpop.xlane.xlu0 %1311 }
 0x3a1   : > { %v1308_v21 = vpop.xlane.xlu0 %1307 }
 0x3a2   : > { %2309 = vrcp.f32 %v1308_v21  ;;  %v1318_v24 = vpop.xlane.xlu1 %1317 }
 0x3a3   : > { %2311 = vrcp.f32 %v1312_v19 }
 0x3a5   : > { %v1320_v5 = vpop.xlane.xlu0 %1319  ;;  %v2308_v27 = vpop.eup %2307 }
 0x3a6   : > { %v1314_v26 = vpop.xlane.xlu1 %1313  ;;  %v1353_v23 = vmul.f32 %v2308_v27, %v3037_v36 }
 0x3a9   : > { %v1316_v31 = vpop.xlane.xlu0 %1315 }
 0x3aa   : > { %v1326_v20 = vpop.xlane.xlu1 %1325  ;;  %2313 = vrcp.f32 %v1316_v31 }
 0x3ab   : > { %2315 = vrcp.f32 %v1310_v8 }
 0x3ac   : > { %v2310_v30 = vpop.eup %2309  ;;  %2317 = vrcp.f32 %v1314_v26 }
 0x3ad   : > { %v1328_v28 = vpop.xlane.xlu0 %1327  ;;  %v1354_v32 = vmul.f32 %v2310_v30, %v3047_v51  ;;  %2319 = vrcp.f32 %v1320_v5  ;;  %v2312_v38 = vpop.eup %2311 }
 0x3ae   : > { %v1322_v34 = vpop.xlane.xlu1 %1321  ;;  %v1356_v42 = vmul.f32 %v2312_v38, %v3042_v43 }
 0x3af   : > { %v1369_v25 = vpack.c.bf16 %v1354_v32, %v1353_v23 }
 0x3b1   : > { %2127 = vmatprep.mubr.bf16.mxu1 %v1369_v25  ;;  %v1324_v35 = vpop.xlane.xlu0 %1323 }
 0x3b2   : > { %v784_v29 = vpop.permute.xlu1 %783  ;;  %2321 = vrcp.f32 %v1324_v35 }
 0x3b3   : > { %800 = vst.msk [vmem:[#allocation3 + $0x38] sm:$0xff] %vm752_vm2, %v784_v29  ;;  %2323 = vrcp.f32 %v1318_v24 }
 0x3b4   : > { %v2314_v39 = vpop.eup %2313  ;;  %2325 = vrcp.f32 %v1322_v34 }
 0x3b5   : > { %v1334_v37 = vpop.xlane.xlu0 %1333  ;;  %v2316_v36 = vpop.eup %2315  ;;  %v1358_v46 = vmul.f32 %v2314_v39, %v3062_v62  ;;  %2327 = vrcp.f32 %v1328_v28 }
 0x3b6   : > { %v2318_v40 = vpop.eup %2317  ;;  %v1355_v49 = vmul.f32 %v2316_v36, %v3034_v22  ;;  %2329 = vrcp.f32 %v1326_v20 }
 0x3b7   : > { %v1357_v50 = vmul.f32 %v2318_v40, %v3057_v47  ;;  %v2320_v33 = vpop.eup %2319 }
 0x3b8   : > { %v1370_v53 = vpack.c.bf16 %v1356_v42, %v1355_v49  ;;  %v1360_v52 = vmul.f32 %v2320_v33, %v3055_v41 }
 0x3b9   : > { %v1330_v44 = vpop.xlane.xlu0 %1329  ;;  %v1371_v43 = vpack.c.bf16 %v1358_v46, %v1357_v50 }
 0x3ba   : > { %v1384_v45 = vld [vmem:[#allocation3 + $0x38] sm:$0xff] }
 0x3bb   : > { %2125 = vmatprep.subr.bf16.mxu1 %v1384_v45 }
 0x3bc   : > { %2126 = vmatpush3.bf16.msra.mxu1 %v1384_v45  ;;  %v2322_v56 = vpop.eup %2321 }
 0x3bd   : > { %v1332_v51 = vpop.xlane.xlu0 %1331  ;;  %2169 = vmatprep.subr.msk.bf16.mxu1 %vm1532_vm5, %v1507_v48  ;;  %v2324_v57 = vpop.eup %2323  ;;  %v1362_v47 = vmul.f32 %v2322_v56, %v3078_v11 }
 0x3be   : > { %2331 = vrcp.f32 %v1332_v51  ;;  %v2326_v22 = vpop.eup %2325  ;;  %v1359_v59 = vmul.f32 %v2324_v57, %v3050_v54 }
 0x3bf   : > { %2333 = vrcp.f32 %v1330_v44  ;;  %2128 = vmatmul.mubr.bf16.vlgmr.msra.gmra.mrb[16].mxu1 %v1370_v53  ;;  %v1361_v60 = vmul.f32 %v2326_v22, %v3073_v6  ;;  %v2328_v62 = vpop.eup %2327 }
 0x3c0   : > { %2131 = vmatprep.mubr.bf16.mxu1 %v1371_v43  ;;  %2144 = vmatpush3.bf16.msra.mxu1 %v1534_v55  ;;  %v1372_v61 = vpack.c.bf16 %v1360_v52, %v1359_v59  ;;  %v2330_v1 = vpop.eup %2329  ;;  %v1364_v7 = vmul.f32 %v2328_v62, %v3070_v4 }
 0x3c1   : > { %v1336_v58 = vpop.xlane.xlu0 %1335  ;;  %v1373_v0 = vpack.c.bf16 %v1362_v47, %v1361_v60  ;;  %v1363_v9 = vmul.f32 %v2330_v1, %v3064_v63 }
 0x3c2   : > { %2335 = vrcp.f32 %v1336_v58 }
 0x3c3   : > { %2337 = vrcp.f32 %v1334_v37  ;;  %v1374_v11 = vpack.c.bf16 %v1364_v7, %v1363_v9 }
 0x3c7   : > { %2132 = vmatmul.mubr.bf16.gmra.mrb[20].mxu1 %v1372_v61 }
 0x3c8   : > { %v2332_v2 = vpop.eup %2331  ;;  %2135 = vmatprep.mubr.bf16.mxu1 %v1373_v0 }
 0x3c9   : > { %v2334_v3 = vpop.eup %2333  ;;  %v1366_v41 = vmul.f32 %v2332_v2, %v3087_v16 }
 0x3ca   : > { %v1365_v54 = vmul.f32 %v2334_v3, %v3084_v10 }
 0x3cc   : > { %v2336_v12 = vpop.eup %2335  ;;  %v1375_v6 = vpack.c.bf16 %v1366_v41, %v1365_v54 }
 0x3cd   : > { %v2338_v13 = vpop.eup %2337  ;;  %v1368_v15 = vmul.f32 %v2336_v12, %v3092_v17 }
 0x3ce   : > { %v1367_v8 = vmul.f32 %v2338_v13, %v3081_v14 }
 0x3cf   : > { %2136 = vmatmul.mubr.bf16.gmra.mrb[24].mxu1 %v1374_v11 }
 0x3d0   : > { %2139 = vmatprep.mubr.bf16.mxu1 %v1375_v6  ;;  %v1376_v18 = vpack.c.bf16 %v1368_v15, %v1367_v8 }
 0x3d7   : > { %2140 = vmatmul.mubr.bf16.gmra.mrb[28].mxu1 %v1376_v18 }
 0x492   : > { %v2129_v19 = vpop.f32.mrb[16].mxu1 }
 0x493   : > { %v1419_v4 = vpop.f32.mrb[17].mxu1 }
 0x494   : > { %v2130_v21 = vpop.f32.mrb[18].mxu1 }
 0x495   : > { %v1500_v16 = vpack.c.bf16 %v2130_v21, %v2129_v19  ;;  %v1422_v24 = vpop.f32.mrb[19].mxu1 }
 0x496   : > { %v1499_v63 = vpack.c.bf16 %v1422_v24, %v1419_v4 }
 0x498   : > { %2145 = vmatprep.mubr.msk.bf16.mxu1 %vm752_vm2, %v1499_v63 }
 0x499   : > { %2146 = vmatmul.mubr.msk.bf16.vlgmr.msra.gmra.mrb[32].mxu1 %vm752_vm2, %v1500_v16 }
 0x49a   : > { %v2133_v10 = vpop.f32.mrb[20].mxu1 }
 0x49b   : > { %v1435_v5 = vpop.f32.mrb[21].mxu1 }
 0x49c   : > { %v2134_v26 = vpop.f32.mrb[22].mxu1 }
 0x49d   : > { %v1502_v31 = vpack.c.bf16 %v2134_v26, %v2133_v10  ;;  %v1438_v27 = vpop.f32.mrb[23].mxu1 }
 0x49e   : > { %v1501_v17 = vpack.c.bf16 %v1438_v27, %v1435_v5 }
 0x4a0   : > { %2149 = vmatprep.mubr.msk.bf16.mxu1 %vm752_vm2, %v1501_v17 }
 0x4a1   : > { %2150 = vmatmul.mubr.msk.bf16.gmra.mrb[36].mxu1 %vm752_vm2, %v1502_v31 }
 0x4a2   : > { %v2137_v14 = vpop.f32.mrb[24].mxu1 }
 0x4a3   : > { %v1451_v20 = vpop.f32.mrb[25].mxu1 }
 0x4a4   : > { %v2138_v30 = vpop.f32.mrb[26].mxu1 }
 0x4a5   : > { %v1504_v28 = vpack.c.bf16 %v2138_v30, %v2137_v14  ;;  %v1454_v23 = vpop.f32.mrb[27].mxu1 }
 0x4a6   : > { %v1503_v32 = vpack.c.bf16 %v1454_v23, %v1451_v20 }
 0x4a8   : > { %2153 = vmatprep.mubr.msk.bf16.mxu1 %vm752_vm2, %v1503_v32 }
 0x4a9   : > { %2154 = vmatmul.mubr.msk.bf16.gmra.mrb[40].mxu1 %vm752_vm2, %v1504_v28 }
 0x4aa   : > { %v2141_v34 = vpop.f32.mrb[28].mxu1 }
 0x4ab   : > { %v1467_v25 = vpop.f32.mrb[29].mxu1 }
 0x4ac   : > { %v2142_v35 = vpop.f32.mrb[30].mxu1 }
 0x4ad   : > { %v1506_v29 = vpack.c.bf16 %v2142_v35, %v2141_v34  ;;  %v1470_v37 = vpop.f32.mrb[31].mxu1 }
 0x4ae   : > { %v1505_v38 = vpack.c.bf16 %v1470_v37, %v1467_v25 }
 0x4b0   : > { %2157 = vmatprep.mubr.msk.bf16.mxu1 %vm752_vm2, %v1505_v38 }
 0x4b1   : > { %2158 = vmatmul.mubr.msk.bf16.gmra.mrb[44].mxu1 %vm752_vm2, %v1506_v29 }
 0x4b2   : > { %2382 = shalt.err (!%p2379_p7)
}
 0x4b3   : > { %s2383_s20 = scalar_lea.hbm %s3127_s29, 2048  ;;  %s2387_s2 = scalar_lea.hbm %s3291_s8, 16384 }
 0x4b4   : > { %p2384_p2 = scmp.ne.s32.totalorder %s3127_s29, %s2383_s20  ;;  %p2388_p9 = scmp.lt.u32.totalorder %s3127_s29, %s3291_s8 }
 0x4b5   : > { %p2389_p12 = scmp.lt.u32.totalorder %s2387_s2, %s2383_s20  ;;  %p2391_p8 = scmp.lt.u32.totalorder %s2383_s20, %s3127_s29 }
 0x4b6   : > { %p2385_p4 = pnand %p2384_p2, %p3292_p11 }
 0x4b7   : > { %p2390_p0 = por %p2389_p12, %p2388_p9 }
 0x4b8   : > { %p2386_p10 = pneg %p2385_p4 }
 0x4b9   : > { %p2392_p13 = por %p2391_p8, %p2390_p0 }
 0x4bb   : > { %p2393_p1 = pnand %p2392_p13, %p2386_p10 }
 0x4bd   : > { %2396 = shalt.err (!%p2393_p1)
}
 0x4be   : > { %s2476_s11 = smov 128   ;;  %s2477_s16 = smov 8   ;;  %v1485_v39 = vld [vmem:[%s2710_s14 + $0x10] sm:$0xff]  ;;  %v1483_v36 = vld [vmem:[%s2710_s14] sm:$0xff]  ;;  %v1486_v42 = vld [vmem:[%s2710_s14 + $0x18] sm:$0xff] }
 0x4bf   : > { %2172 = dma.vmem_to_hbm [thread:$0]  (%p3292_p11), %s3129_s26, 2048, %s3127_s29, %s1671_s24, %s2476_s11, %s2476_s11, %s2477_s16  }
 0x4c0   : > { %v1484_v46 = vld [vmem:[%s2710_s14 + $0x8] sm:$0xff]  ;;  %v1489_v55 = vld [vmem:[%s2710_s14 + $0x30] sm:$0xff]  ;;  %v1487_v33 = vld [vmem:[%s2710_s14 + $0x20] sm:$0xff] }
 0x4c1   : > { %v1490_v56 = vld [vmem:[%s2710_s14 + $0x38] sm:$0xff]  ;;  %v1488_v58 = vld [vmem:[%s2710_s14 + $0x28] sm:$0xff]  ;;  %v1493_v62 = vld [vmem:[%s2710_s14 + $0x50] sm:$0xff] }
 0x4c2   : > { %v1491_v0 = vld [vmem:[%s2710_s14 + $0x40] sm:$0xff]  ;;  %v1494_v2 = vld [vmem:[%s2710_s14 + $0x58] sm:$0xff]  ;;  %v1492_v41 = vld [vmem:[%s2710_s14 + $0x48] sm:$0xff] }
 0x4c3   : > { %v1497_v13 = vld [vmem:[%s2710_s14 + $0x70] sm:$0xff]  ;;  %v1495_v15 = vld [vmem:[%s2710_s14 + $0x60] sm:$0xff]  ;;  %v1498_v18 = vld [vmem:[%s2710_s14 + $0x78] sm:$0xff] }
 0x4c4   : > { %v1496_v21 = vld [vmem:[%s2710_s14 + $0x68] sm:$0xff] }
 0x56c   : > { %v2147_v40 = vpop.f32.mrb[32].mxu1 }
 0x56d   : > { %v1635_v44 = vadd.f32 %v2147_v40, %v1485_v39  ;;  %v1570_v45 = vpop.f32.mrb[33].mxu1 }
 0x56e   : > { %v1633_v48 = vadd.f32 %v1570_v45, %v1483_v36  ;;  %v2148_v49 = vpop.f32.mrb[34].mxu1 }
 0x56f   : > { %1651 = vst.msk [vmem:[%s2710_s14 + $0x10] sm:$0xff] %vm622_vm1, %v1635_v44  ;;  %v1636_v50 = vadd.f32 %v2148_v49, %v1486_v42  ;;  %v1573_v51 = vpop.f32.mrb[35].mxu1 }
 0x570   : > { %1649 = vst.msk [vmem:[%s2710_s14] sm:$0xff] %vm622_vm1, %v1633_v48  ;;  %v1634_v53 = vadd.f32 %v1573_v51, %v1484_v46 }
 0x571   : > { %1652 = vst.msk [vmem:[%s2710_s14 + $0x18] sm:$0xff] %vm622_vm1, %v1636_v50 }
 0x572   : > { %1650 = vst.msk [vmem:[%s2710_s14 + $0x8] sm:$0xff] %vm622_vm1, %v1634_v53 }
 0x574   : > { %v2151_v43 = vpop.f32.mrb[36].mxu1 }
 0x575   : > { %v1639_v57 = vadd.f32 %v2151_v43, %v1489_v55  ;;  %v1586_v22 = vpop.f32.mrb[37].mxu1 }
 0x576   : > { %v1637_v52 = vadd.f32 %v1586_v22, %v1487_v33  ;;  %v2152_v47 = vpop.f32.mrb[38].mxu1 }
 0x577   : > { %1655 = vst.msk [vmem:[%s2710_s14 + $0x30] sm:$0xff] %vm622_vm1, %v1639_v57  ;;  %v1640_v59 = vadd.f32 %v2152_v47, %v1490_v56  ;;  %v1589_v60 = vpop.f32.mrb[39].mxu1 }
 0x578   : > { %1653 = vst.msk [vmem:[%s2710_s14 + $0x20] sm:$0xff] %vm622_vm1, %v1637_v52  ;;  %v1638_v61 = vadd.f32 %v1589_v60, %v1488_v58 }
 0x579   : > { %1656 = vst.msk [vmem:[%s2710_s14 + $0x38] sm:$0xff] %vm622_vm1, %v1640_v59 }
 0x57a   : > { %1654 = vst.msk [vmem:[%s2710_s14 + $0x28] sm:$0xff] %vm622_vm1, %v1638_v61 }
 0x57c   : > { %v2155_v1 = vpop.f32.mrb[40].mxu1 }
 0x57d   : > { %v1643_v3 = vadd.f32 %v2155_v1, %v1493_v62  ;;  %v1602_v7 = vpop.f32.mrb[41].mxu1 }
 0x57e   : > { %v1641_v9 = vadd.f32 %v1602_v7, %v1491_v0  ;;  %v2156_v54 = vpop.f32.mrb[42].mxu1 }
 0x57f   : > { %1659 = vst.msk [vmem:[%s2710_s14 + $0x50] sm:$0xff] %vm622_vm1, %v1643_v3  ;;  %v1644_v11 = vadd.f32 %v2156_v54, %v1494_v2  ;;  %v1605_v12 = vpop.f32.mrb[43].mxu1 }
 0x580   : > { %1657 = vst.msk [vmem:[%s2710_s14 + $0x40] sm:$0xff] %vm622_vm1, %v1641_v9  ;;  %v1642_v6 = vadd.f32 %v1605_v12, %v1492_v41 }
 0x581   : > { %1660 = vst.msk [vmem:[%s2710_s14 + $0x58] sm:$0xff] %vm622_vm1, %v1644_v11 }
 0x582   : > { %1658 = vst.msk [vmem:[%s2710_s14 + $0x48] sm:$0xff] %vm622_vm1, %v1642_v6 }
 0x584   : > { %v2159_v8 = vpop.f32.mrb[44].mxu1 }
 0x585   : > { %v1647_v19 = vadd.f32 %v2159_v8, %v1497_v13  ;;  %v1618_v4 = vpop.f32.mrb[45].mxu1 }
 0x586   : > { %v1645_v16 = vadd.f32 %v1618_v4, %v1495_v15  ;;  %v2160_v24 = vpop.f32.mrb[46].mxu1 }
 0x587   : > { %1663 = vst.msk [vmem:[%s2710_s14 + $0x70] sm:$0xff] %vm622_vm1, %v1647_v19  ;;  %v1648_v63 = vadd.f32 %v2160_v24, %v1498_v18  ;;  %v1621_v10 = vpop.f32.mrb[47].mxu1 }
 0x588   : > { %1661 = vst.msk [vmem:[%s2710_s14 + $0x60] sm:$0xff] %vm622_vm1, %v1645_v16  ;;  %v1646_v5 = vadd.f32 %v1621_v10, %v1496_v21 }
 0x589   : > { %1664 = vst.msk [vmem:[%s2710_s14 + $0x78] sm:$0xff] %vm622_vm1, %v1648_v63 }
 0x58a   : > { %1662 = vst.msk [vmem:[%s2710_s14 + $0x68] sm:$0xff] %vm622_vm1, %v1646_v5 }
 0x58b PF: > { %s3293_s25 = sld [smem:[#allocation15_spill]]  ;;  %s3294_s28 = sld [smem:[#allocation10_spill]] }
 0x58c   : > { %s3295_s17 = sld [smem:[#allocation19_spill]] }
 0x591   : > { %p2183_p11 = scmp.ge.s32.totalorder %s3293_s25, 2  ;;  %s1714_s30 = sand.u32 1, %s3294_s28  }
 0x592   : > { %p3296_p3 = scmp.ne.s32.totalorder %s3295_s17, 0  ;;  %s1715_s19 = scalar_lea.sflag [#allocation6], %s1714_s30 }
 0x594   : > { %p2179_p5 = pnand %p2183_p11, %p3296_p3 }
 0x596   : > { %2434 = dma.done.wait (!%p2179_p5), %s1715_s19, 2048  }
 0x597   : > { %2436 = vsyncadd (!%p2179_p5), %s1715_s19, 4294965248  ;;  %s26_s16 = sadd.s32 1, %s3293_s25   ;;  %s3297_s30 = sld [smem:[#allocation11_spill]] }
 0x598   : > { %p23_p6 = scmp.ge.s32.totalorder %s26_s16, 10   ;;  %s3298_s10 = sld [smem:[#allocation12_spill]] }
 0x599   : > { %s3299_s11 = sld [smem:[#allocation20_spill]]  ;;  %s3300_s12 = sld [smem:[#allocation13_spill]] }
 0x59a   : > { %s3301_s13 = sld [smem:[#allocation14_spill]]  ;;  %s3302_s14 = sld [smem:[#allocation16_spill]] }
 0x59b   : > { %s3303_s15 = sld [smem:[#allocation17_spill]]  ;;  %25 = sbr.rel (!%p23_p6) target bundleno = 15 (0xf), region = 140 }
 0x5a2   :  { %1720 = vsyncpa [#allocation5], 1 }
 0x5a3   :  { %1722 = vsyncpa [#allocation5 + $0x1], 1 }
 0x5a4   :  { %1723 = vsyncpa [#allocation6], 1 }
 0x5a5   :  { %1725 = vsyncpa [#allocation6 + $0x1], 1 }

</bundles_post_ra>
